<compile_context>
chip_gen: v7x
topology: tpu7x:2x2x1
jax: 0.10.0
libtpu: 0.0.40
codegen_flags: <defaults>
</compile_context>

<pallas_src>
import jax
import jax.numpy as jnp
from jax.experimental import pallas as pl
from jax.experimental.pallas import tpu as pltpu

D = 3
D_RESIDUE = 1
D_TRANSFORM = D - D_RESIDUE          # 2
HIDDEN = 50
OUT_DIM = 2 * D_TRANSFORM            # 4


def flow_kernel(x_ref, w1_ref, wh_ref, w4_ref, bh_ref, b4_ref, o_ref):
    n_layers = w1_ref.shape[0]       # static

    # State rows kept as three separate (1, bt) f32 values -> the 3-cycle
    # permutation is pure trace-time bookkeeping (no sublane merges per layer).
    rows = [x_ref[0:1, :], x_ref[1:2, :], x_ref[2:3, :]]

    # Static unroll over layers; all weights are whole VMEM-resident blocks and
    # the perm index l % 3 is a trace-time constant.
    for l in range(n_layers):
        x_res = rows[0]                                                    # (1, bt)

        # Layer 1 is a rank-1 (50x1)@(1,bt) product -> VPU broadcast FMA in f32,
        # keeping the MXU (the saturated unit) free.
        h = jnp.maximum(w1_ref[l] * x_res + bh_ref[l, 0], 0.0)            # (50, bt) f32

        # Hidden / output layers on the MXU with bf16 operands, f32 accumulate.
        h = jnp.maximum(
            jnp.dot(wh_ref[l, 0], h.astype(jnp.bfloat16),
                    preferred_element_type=jnp.float32) + bh_ref[l, 1], 0.0)
        h = jnp.maximum(
            jnp.dot(wh_ref[l, 1], h.astype(jnp.bfloat16),
                    preferred_element_type=jnp.float32) + bh_ref[l, 2], 0.0)
        out = jnp.dot(w4_ref[l], h.astype(jnp.bfloat16),
                      preferred_element_type=jnp.float32) + b4_ref[l]     # (4, bt) f32

        # TODO(synk): relie's CouplingTransform chunk order (shift vs log_scale)
        # assumed (shift, log_scale); identical while the last layer is zeroed.
        shift = out[0:D_TRANSFORM, :]
        log_scale = out[D_TRANSFORM:, :]
        y1 = rows[1] * jnp.exp(log_scale[0:1, :]) + shift[0:1, :]
        y2 = rows[2] * jnp.exp(log_scale[1:2, :]) + shift[1:2, :]

        # PermuteTransform: new state = y[perm], perm = rotate-left by (l % 3).
        y = [rows[0], y1, y2]
        m = l % 3
        rows = y[m:] + y[:m]

    o_ref[...] = jnp.concatenate(rows, axis=0)                             # (3, bt)


def flow_forward(x, params):
    """x: (B, 3) float32; params: tuple of stacked per-layer weights (f32)."""
    W1, b1, W2, b2, W3, b3, W4, b4 = params
    L = W1.shape[0]
    B = x.shape[0]

    # Pack weights: fewer inputs -> fewer DMA descriptors / prologue copies.
    # Matmul operands stored in bf16; VPU-side params (W1, biases) stay f32.
    Wh = jnp.stack([W2, W3], axis=1).astype(jnp.bfloat16)   # (L, 2, 50, 50)
    W4b = W4.astype(jnp.bfloat16)                            # (L, 4, 50)
    Bh = jnp.stack([b1, b2, b3], axis=1)                     # (L, 3, 50, 1) f32

    # Batch lane tile: multiple of 128, cap 2048; ~B/2 so B > 128 gives >= 2
    # "parallel" tiles (dual-TC v7x), single 128 tile for tiny batches.
    bt = max(128, min(2048, ((B + 255) // 256) * 128))
    Bp = ((B + bt - 1) // bt) * bt
    n_tiles = Bp // bt

    xt = jnp.zeros((D, Bp), jnp.float32).at[:, :B].set(x.T.astype(jnp.float32))

    def full_spec(arr):
        # Whole array resident in VMEM, same block for every batch tile.
        nd = arr.ndim
        return pl.BlockSpec(arr.shape, lambda b, _nd=nd: (0,) * _nd)

    flops = 2 * B * L * (HIDDEN + 2 * HIDDEN * HIDDEN + OUT_DIM * HIDDEN)
    bytes_accessed = (2 * D * Bp * 4
                      + (Wh.size + W4b.size) * 2
                      + (W1.size + Bh.size + b4.size) * 4)
    cost = pl.CostEstimate(flops=int(flops),
                           transcendentals=int(B * L * D_TRANSFORM),
                           bytes_accessed=int(bytes_accessed))

    out = pl.pallas_call(
        flow_kernel,
        out_shape=jax.ShapeDtypeStruct((D, Bp), jnp.float32),
        grid=(n_tiles,),
        in_specs=[pl.BlockSpec((D, bt), lambda b: (0, b)),
                  full_spec(W1), full_spec(Wh), full_spec(W4b),
                  full_spec(Bh), full_spec(b4)],
        out_specs=pl.BlockSpec((D, bt), lambda b: (0, b)),   # lane-dense output block
        compiler_params=pltpu.CompilerParams(
            dimension_semantics=("parallel",),
        ),
        cost_estimate=cost,
    )(xt, W1, Wh, W4b, Bh, b4)
    return out[:, :B].T


def init_params(key, n_layers):
    """PyTorch nn.Linear-style uniform init; last layer zeroed (identity coupling)."""
    def uniform(kk, shape, fan_in):
        bound = float(fan_in) ** -0.5
        return jax.random.uniform(kk, shape, jnp.float32, -bound, bound)

    W1s, b1s, W2s, b2s, W3s, b3s, W4s, b4s = ([] for _ in range(8))
    for k in jax.random.split(key, n_layers):
        k1, kb1, k2, kb2, k3, kb3 = jax.random.split(k, 6)
        W1s.append(uniform(k1, (HIDDEN, D_RESIDUE), D_RESIDUE))
        b1s.append(uniform(kb1, (HIDDEN, 1), D_RESIDUE))
        W2s.append(uniform(k2, (HIDDEN, HIDDEN), HIDDEN))
        b2s.append(uniform(kb2, (HIDDEN, 1), HIDDEN))
        W3s.append(uniform(k3, (HIDDEN, HIDDEN), HIDDEN))
        b3s.append(uniform(kb3, (HIDDEN, 1), HIDDEN))
        # _set_params(): last linear layer weight & bias zeroed -> identity coupling.
        W4s.append(jnp.zeros((OUT_DIM, HIDDEN), jnp.float32))
        b4s.append(jnp.zeros((OUT_DIM, 1), jnp.float32))
    return tuple(jnp.stack(a) for a in (W1s, b1s, W2s, b2s, W3s, b3s, W4s, b4s))


def flow_ref(x, params):
    """Pure-JAX (f32) reference of the same composed transform."""
    W1, b1, W2, b2, W3, b3, W4, b4 = params
    n_layers = W1.shape[0]
    perms = [jnp.array([0, 1, 2]), jnp.array([1, 2, 0]), jnp.array([2, 0, 1])]
    for l in range(n_layers):
        xr, xt = x[:, :D_RESIDUE], x[:, D_RESIDUE:]
        h = jnp.maximum(xr @ W1[l].T + b1[l][:, 0], 0.0)
        h = jnp.maximum(h @ W2[l].T + b2[l][:, 0], 0.0)
        h = jnp.maximum(h @ W3[l].T + b3[l][:, 0], 0.0)
        o = h @ W4[l].T + b4[l][:, 0]
        shift, log_scale = o[:, :D_TRANSFORM], o[:, D_TRANSFORM:]
        y = jnp.concatenate([xr, xt * jnp.exp(log_scale) + shift], axis=1)
        x = y[:, perms[l % 3]]
    return x


if __name__ == "__main__":
    key = jax.random.PRNGKey(0)
    kx, kp, kw, kb = jax.random.split(key, 4)
    n_layers = 6
    B = 8
    x = jax.random.normal(kx, (B, D), jnp.float32)
    params = init_params(kp, n_layers)

    flow_jit = jax.jit(flow_forward)   # fuses the pad/transpose/pack around the pallas_call

    # 1) Module-faithful params: zeroed last layers -> identity couplings; this
    #    exercises the permutation path exactly (bf16 weights are irrelevant here).
    y0 = jax.block_until_ready(flow_jit(x, params))
    y0_ref = flow_ref(x, params)
    assert y0.shape == (B, D)
    assert jnp.allclose(y0, y0_ref, atol=1e-5, rtol=1e-5), "mismatch (identity couplings)"

    # 2) Perturb the last layers with small random values so the matmul / exp /
    #    coupling path is actually validated (the zero init would mask bugs there).
    W1, b1, W2, b2, W3, b3, W4, b4 = params
    W4p = 0.05 * jax.random.normal(kw, W4.shape, jnp.float32)
    b4p = 0.05 * jax.random.normal(kb, b4.shape, jnp.float32)
    params_p = (W1, b1, W2, b2, W3, b3, W4p, b4p)
    y1 = jax.block_until_ready(flow_jit(x, params_p))
    y1_ref = flow_ref(x, params_p)
    # bf16 matmul operands through 6 layers -> loosened tolerance vs f32 reference.
    assert jnp.allclose(y1, y1_ref, atol=5e-2, rtol=5e-2), "mismatch (active couplings)"

    print("KERNEL_OK")
</pallas_src>

<mosaic_0001>
module attributes {stable_mosaic.version = 11 : i64} {
  func.func @flow_kernel(%arg0: i32, %arg1: memref<3x128xf32, #tpu.memory_space<vmem>>, %arg2: memref<6x50x1xf32, #tpu.memory_space<vmem>>, %arg3: memref<6x2x50x50xbf16, #tpu.memory_space<vmem>>, %arg4: memref<6x4x50xbf16, #tpu.memory_space<vmem>>, %arg5: memref<6x3x50x1xf32, #tpu.memory_space<vmem>>, %arg6: memref<6x4x1xf32, #tpu.memory_space<vmem>>, %arg7: memref<3x128xf32, #tpu.memory_space<vmem>>) attributes {dimension_semantics = [#tpu.dimension_semantics<parallel>], iteration_bounds = array<i64: 1>, scalar_prefetch = 0 : i64, scratch_operands = 0 : i64, tpu.core_type = #tpu.core_type<tc>, window_params = [{transform_indices = @transform_0, window_bounds = array<i64: 3, 128>}, {pipeline_mode = #tpu.pipeline_mode<synchronous>, transform_indices = @transform_1, window_bounds = array<i64: 6, 50, 1>}, {pipeline_mode = #tpu.pipeline_mode<synchronous>, transform_indices = @transform_2, window_bounds = array<i64: 6, 2, 50, 50>}, {pipeline_mode = #tpu.pipeline_mode<synchronous>, transform_indices = @transform_3, window_bounds = array<i64: 6, 4, 50>}, {pipeline_mode = #tpu.pipeline_mode<synchronous>, transform_indices = @transform_4, window_bounds = array<i64: 6, 3, 50, 1>}, {pipeline_mode = #tpu.pipeline_mode<synchronous>, transform_indices = @transform_5, window_bounds = array<i64: 6, 4, 1>}, {transform_indices = @transform_6, window_bounds = array<i64: 3, 128>}]} {
    %c0 = arith.constant 0 : index
    %c0_0 = arith.constant 0 : index
    %0 = vector.load %arg1[%c0, %c0_0] : memref<3x128xf32, #tpu.memory_space<vmem>>, vector<1x128xf32>
    %c1 = arith.constant 1 : index
    %c0_1 = arith.constant 0 : index
    %1 = vector.load %arg1[%c1, %c0_1] : memref<3x128xf32, #tpu.memory_space<vmem>>, vector<1x128xf32>
    %c2 = arith.constant 2 : index
    %c0_2 = arith.constant 0 : index
    %2 = vector.load %arg1[%c2, %c0_2] : memref<3x128xf32, #tpu.memory_space<vmem>>, vector<1x128xf32>
    %c0_3 = arith.constant 0 : index
    %c0_4 = arith.constant 0 : index
    %c0_5 = arith.constant 0 : index
    %3 = vector.load %arg2[%c0_3, %c0_4, %c0_5] : memref<6x50x1xf32, #tpu.memory_space<vmem>>, vector<1x50x1xf32>
    %4 = vector.shape_cast %3 : vector<1x50x1xf32> to vector<50x1xf32>
    %5 = vector.broadcast %4 : vector<50x1xf32> to vector<50x128xf32>
    %6 = vector.broadcast %0 : vector<1x128xf32> to vector<50x128xf32>
    %7 = arith.mulf %5, %6 : vector<50x128xf32>
    %c0_6 = arith.constant 0 : index
    %c0_7 = arith.constant 0 : index
    %c0_8 = arith.constant 0 : index
    %c0_9 = arith.constant 0 : index
    %8 = vector.load %arg5[%c0_6, %c0_7, %c0_8, %c0_9] : memref<6x3x50x1xf32, #tpu.memory_space<vmem>>, vector<1x1x50x1xf32>
    %9 = vector.shape_cast %8 : vector<1x1x50x1xf32> to vector<50x1xf32>
    %10 = vector.broadcast %9 : vector<50x1xf32> to vector<50x128xf32>
    %11 = arith.addf %7, %10 : vector<50x128xf32>
    %cst = arith.constant 0.000000e+00 : f32
    %12 = vector.broadcast %cst : f32 to vector<50x128xf32>
    %13 = arith.maximumf %11, %12 : vector<50x128xf32>
    %c0_10 = arith.constant 0 : index
    %c0_11 = arith.constant 0 : index
    %c0_12 = arith.constant 0 : index
    %c0_13 = arith.constant 0 : index
    %14 = vector.load %arg3[%c0_10, %c0_11, %c0_12, %c0_13] : memref<6x2x50x50xbf16, #tpu.memory_space<vmem>>, vector<1x1x50x50xbf16>
    %15 = vector.shape_cast %14 : vector<1x1x50x50xbf16> to vector<50x50xbf16>
    %16 = arith.truncf %13 : vector<50x128xf32> to vector<50x128xbf16>
    %cst_14 = arith.constant dense<0.000000e+00> : vector<50x128xf32>
    %17 = tpu.matmul %15, %16, %cst_14 {dimension_numbers = #tpu.dot_dimension_numbers<[1], [0], [0], [1], [0, 0, 1, 1], [], []>} : vector<50x50xbf16>, vector<50x128xbf16>, vector<50x128xf32> -> vector<50x128xf32>
    %c0_15 = arith.constant 0 : index
    %c1_16 = arith.constant 1 : index
    %c0_17 = arith.constant 0 : index
    %c0_18 = arith.constant 0 : index
    %18 = vector.load %arg5[%c0_15, %c1_16, %c0_17, %c0_18] : memref<6x3x50x1xf32, #tpu.memory_space<vmem>>, vector<1x1x50x1xf32>
    %19 = vector.shape_cast %18 : vector<1x1x50x1xf32> to vector<50x1xf32>
    %20 = vector.broadcast %19 : vector<50x1xf32> to vector<50x128xf32>
    %21 = arith.addf %17, %20 : vector<50x128xf32>
    %cst_19 = arith.constant 0.000000e+00 : f32
    %22 = vector.broadcast %cst_19 : f32 to vector<50x128xf32>
    %23 = arith.maximumf %21, %22 : vector<50x128xf32>
    %c0_20 = arith.constant 0 : index
    %c1_21 = arith.constant 1 : index
    %c0_22 = arith.constant 0 : index
    %c0_23 = arith.constant 0 : index
    %24 = vector.load %arg3[%c0_20, %c1_21, %c0_22, %c0_23] : memref<6x2x50x50xbf16, #tpu.memory_space<vmem>>, vector<1x1x50x50xbf16>
    %25 = vector.shape_cast %24 : vector<1x1x50x50xbf16> to vector<50x50xbf16>
    %26 = arith.truncf %23 : vector<50x128xf32> to vector<50x128xbf16>
    %cst_24 = arith.constant dense<0.000000e+00> : vector<50x128xf32>
    %27 = tpu.matmul %25, %26, %cst_24 {dimension_numbers = #tpu.dot_dimension_numbers<[1], [0], [0], [1], [0, 0, 1, 1], [], []>} : vector<50x50xbf16>, vector<50x128xbf16>, vector<50x128xf32> -> vector<50x128xf32>
    %c0_25 = arith.constant 0 : index
    %c2_26 = arith.constant 2 : index
    %c0_27 = arith.constant 0 : index
    %c0_28 = arith.constant 0 : index
    %28 = vector.load %arg5[%c0_25, %c2_26, %c0_27, %c0_28] : memref<6x3x50x1xf32, #tpu.memory_space<vmem>>, vector<1x1x50x1xf32>
    %29 = vector.shape_cast %28 : vector<1x1x50x1xf32> to vector<50x1xf32>
    %30 = vector.broadcast %29 : vector<50x1xf32> to vector<50x128xf32>
    %31 = arith.addf %27, %30 : vector<50x128xf32>
    %cst_29 = arith.constant 0.000000e+00 : f32
    %32 = vector.broadcast %cst_29 : f32 to vector<50x128xf32>
    %33 = arith.maximumf %31, %32 : vector<50x128xf32>
    %c0_30 = arith.constant 0 : index
    %c0_31 = arith.constant 0 : index
    %c0_32 = arith.constant 0 : index
    %34 = vector.load %arg4[%c0_30, %c0_31, %c0_32] : memref<6x4x50xbf16, #tpu.memory_space<vmem>>, vector<1x4x50xbf16>
    %35 = vector.shape_cast %34 : vector<1x4x50xbf16> to vector<4x50xbf16>
    %36 = arith.truncf %33 : vector<50x128xf32> to vector<50x128xbf16>
    %cst_33 = arith.constant dense<0.000000e+00> : vector<4x128xf32>
    %37 = tpu.matmul %35, %36, %cst_33 {dimension_numbers = #tpu.dot_dimension_numbers<[1], [0], [0], [1], [0, 0, 1, 1], [], []>} : vector<4x50xbf16>, vector<50x128xbf16>, vector<4x128xf32> -> vector<4x128xf32>
    %c0_34 = arith.constant 0 : index
    %c0_35 = arith.constant 0 : index
    %c0_36 = arith.constant 0 : index
    %38 = vector.load %arg6[%c0_34, %c0_35, %c0_36] : memref<6x4x1xf32, #tpu.memory_space<vmem>>, vector<1x4x1xf32>
    %39 = vector.shape_cast %38 : vector<1x4x1xf32> to vector<4x1xf32>
    %40 = vector.broadcast %39 : vector<4x1xf32> to vector<4x128xf32>
    %41 = arith.addf %37, %40 : vector<4x128xf32>
    %42 = vector.extract_strided_slice %41 {offsets = [0, 0], sizes = [2, 128], strides = [1, 1]} : vector<4x128xf32> to vector<2x128xf32>
    %43 = vector.extract_strided_slice %41 {offsets = [2, 0], sizes = [2, 128], strides = [1, 1]} : vector<4x128xf32> to vector<2x128xf32>
    %44 = vector.extract_strided_slice %43 {offsets = [0, 0], sizes = [1, 128], strides = [1, 1]} : vector<2x128xf32> to vector<1x128xf32>
    %45 = math.exp %44 : vector<1x128xf32>
    %46 = arith.mulf %1, %45 : vector<1x128xf32>
    %47 = vector.extract_strided_slice %42 {offsets = [0, 0], sizes = [1, 128], strides = [1, 1]} : vector<2x128xf32> to vector<1x128xf32>
    %48 = arith.addf %46, %47 : vector<1x128xf32>
    %49 = vector.extract_strided_slice %43 {offsets = [1, 0], sizes = [1, 128], strides = [1, 1]} : vector<2x128xf32> to vector<1x128xf32>
    %50 = math.exp %49 : vector<1x128xf32>
    %51 = arith.mulf %2, %50 : vector<1x128xf32>
    %52 = vector.extract_strided_slice %42 {offsets = [1, 0], sizes = [1, 128], strides = [1, 1]} : vector<2x128xf32> to vector<1x128xf32>
    %53 = arith.addf %51, %52 : vector<1x128xf32>
    %c1_37 = arith.constant 1 : index
    %c0_38 = arith.constant 0 : index
    %c0_39 = arith.constant 0 : index
    %54 = vector.load %arg2[%c1_37, %c0_38, %c0_39] : memref<6x50x1xf32, #tpu.memory_space<vmem>>, vector<1x50x1xf32>
    %55 = vector.shape_cast %54 : vector<1x50x1xf32> to vector<50x1xf32>
    %56 = vector.broadcast %55 : vector<50x1xf32> to vector<50x128xf32>
    %57 = vector.broadcast %0 : vector<1x128xf32> to vector<50x128xf32>
    %58 = arith.mulf %56, %57 : vector<50x128xf32>
    %c1_40 = arith.constant 1 : index
    %c0_41 = arith.constant 0 : index
    %c0_42 = arith.constant 0 : index
    %c0_43 = arith.constant 0 : index
    %59 = vector.load %arg5[%c1_40, %c0_41, %c0_42, %c0_43] : memref<6x3x50x1xf32, #tpu.memory_space<vmem>>, vector<1x1x50x1xf32>
    %60 = vector.shape_cast %59 : vector<1x1x50x1xf32> to vector<50x1xf32>
    %61 = vector.broadcast %60 : vector<50x1xf32> to vector<50x128xf32>
    %62 = arith.addf %58, %61 : vector<50x128xf32>
    %cst_44 = arith.constant 0.000000e+00 : f32
    %63 = vector.broadcast %cst_44 : f32 to vector<50x128xf32>
    %64 = arith.maximumf %62, %63 : vector<50x128xf32>
    %c1_45 = arith.constant 1 : index
    %c0_46 = arith.constant 0 : index
    %c0_47 = arith.constant 0 : index
    %c0_48 = arith.constant 0 : index
    %65 = vector.load %arg3[%c1_45, %c0_46, %c0_47, %c0_48] : memref<6x2x50x50xbf16, #tpu.memory_space<vmem>>, vector<1x1x50x50xbf16>
    %66 = vector.shape_cast %65 : vector<1x1x50x50xbf16> to vector<50x50xbf16>
    %67 = arith.truncf %64 : vector<50x128xf32> to vector<50x128xbf16>
    %cst_49 = arith.constant dense<0.000000e+00> : vector<50x128xf32>
    %68 = tpu.matmul %66, %67, %cst_49 {dimension_numbers = #tpu.dot_dimension_numbers<[1], [0], [0], [1], [0, 0, 1, 1], [], []>} : vector<50x50xbf16>, vector<50x128xbf16>, vector<50x128xf32> -> vector<50x128xf32>
    %c1_50 = arith.constant 1 : index
    %c1_51 = arith.constant 1 : index
    %c0_52 = arith.constant 0 : index
    %c0_53 = arith.constant 0 : index
    %69 = vector.load %arg5[%c1_50, %c1_51, %c0_52, %c0_53] : memref<6x3x50x1xf32, #tpu.memory_space<vmem>>, vector<1x1x50x1xf32>
    %70 = vector.shape_cast %69 : vector<1x1x50x1xf32> to vector<50x1xf32>
    %71 = vector.broadcast %70 : vector<50x1xf32> to vector<50x128xf32>
    %72 = arith.addf %68, %71 : vector<50x128xf32>
    %cst_54 = arith.constant 0.000000e+00 : f32
    %73 = vector.broadcast %cst_54 : f32 to vector<50x128xf32>
    %74 = arith.maximumf %72, %73 : vector<50x128xf32>
    %c1_55 = arith.constant 1 : index
    %c1_56 = arith.constant 1 : index
    %c0_57 = arith.constant 0 : index
    %c0_58 = arith.constant 0 : index
    %75 = vector.load %arg3[%c1_55, %c1_56, %c0_57, %c0_58] : memref<6x2x50x50xbf16, #tpu.memory_space<vmem>>, vector<1x1x50x50xbf16>
    %76 = vector.shape_cast %75 : vector<1x1x50x50xbf16> to vector<50x50xbf16>
    %77 = arith.truncf %74 : vector<50x128xf32> to vector<50x128xbf16>
    %cst_59 = arith.constant dense<0.000000e+00> : vector<50x128xf32>
    %78 = tpu.matmul %76, %77, %cst_59 {dimension_numbers = #tpu.dot_dimension_numbers<[1], [0], [0], [1], [0, 0, 1, 1], [], []>} : vector<50x50xbf16>, vector<50x128xbf16>, vector<50x128xf32> -> vector<50x128xf32>
    %c1_60 = arith.constant 1 : index
    %c2_61 = arith.constant 2 : index
    %c0_62 = arith.constant 0 : index
    %c0_63 = arith.constant 0 : index
    %79 = vector.load %arg5[%c1_60, %c2_61, %c0_62, %c0_63] : memref<6x3x50x1xf32, #tpu.memory_space<vmem>>, vector<1x1x50x1xf32>
    %80 = vector.shape_cast %79 : vector<1x1x50x1xf32> to vector<50x1xf32>
    %81 = vector.broadcast %80 : vector<50x1xf32> to vector<50x128xf32>
    %82 = arith.addf %78, %81 : vector<50x128xf32>
    %cst_64 = arith.constant 0.000000e+00 : f32
    %83 = vector.broadcast %cst_64 : f32 to vector<50x128xf32>
    %84 = arith.maximumf %82, %83 : vector<50x128xf32>
    %c1_65 = arith.constant 1 : index
    %c0_66 = arith.constant 0 : index
    %c0_67 = arith.constant 0 : index
    %85 = vector.load %arg4[%c1_65, %c0_66, %c0_67] : memref<6x4x50xbf16, #tpu.memory_space<vmem>>, vector<1x4x50xbf16>
    %86 = vector.shape_cast %85 : vector<1x4x50xbf16> to vector<4x50xbf16>
    %87 = arith.truncf %84 : vector<50x128xf32> to vector<50x128xbf16>
    %cst_68 = arith.constant dense<0.000000e+00> : vector<4x128xf32>
    %88 = tpu.matmul %86, %87, %cst_68 {dimension_numbers = #tpu.dot_dimension_numbers<[1], [0], [0], [1], [0, 0, 1, 1], [], []>} : vector<4x50xbf16>, vector<50x128xbf16>, vector<4x128xf32> -> vector<4x128xf32>
    %c1_69 = arith.constant 1 : index
    %c0_70 = arith.constant 0 : index
    %c0_71 = arith.constant 0 : index
    %89 = vector.load %arg6[%c1_69, %c0_70, %c0_71] : memref<6x4x1xf32, #tpu.memory_space<vmem>>, vector<1x4x1xf32>
    %90 = vector.shape_cast %89 : vector<1x4x1xf32> to vector<4x1xf32>
    %91 = vector.broadcast %90 : vector<4x1xf32> to vector<4x128xf32>
    %92 = arith.addf %88, %91 : vector<4x128xf32>
    %93 = vector.extract_strided_slice %92 {offsets = [0, 0], sizes = [2, 128], strides = [1, 1]} : vector<4x128xf32> to vector<2x128xf32>
    %94 = vector.extract_strided_slice %92 {offsets = [2, 0], sizes = [2, 128], strides = [1, 1]} : vector<4x128xf32> to vector<2x128xf32>
    %95 = vector.extract_strided_slice %94 {offsets = [0, 0], sizes = [1, 128], strides = [1, 1]} : vector<2x128xf32> to vector<1x128xf32>
    %96 = math.exp %95 : vector<1x128xf32>
    %97 = arith.mulf %48, %96 : vector<1x128xf32>
    %98 = vector.extract_strided_slice %93 {offsets = [0, 0], sizes = [1, 128], strides = [1, 1]} : vector<2x128xf32> to vector<1x128xf32>
    %99 = arith.addf %97, %98 : vector<1x128xf32>
    %100 = vector.extract_strided_slice %94 {offsets = [1, 0], sizes = [1, 128], strides = [1, 1]} : vector<2x128xf32> to vector<1x128xf32>
    %101 = math.exp %100 : vector<1x128xf32>
    %102 = arith.mulf %53, %101 : vector<1x128xf32>
    %103 = vector.extract_strided_slice %93 {offsets = [1, 0], sizes = [1, 128], strides = [1, 1]} : vector<2x128xf32> to vector<1x128xf32>
    %104 = arith.addf %102, %103 : vector<1x128xf32>
    %c2_72 = arith.constant 2 : index
    %c0_73 = arith.constant 0 : index
    %c0_74 = arith.constant 0 : index
    %105 = vector.load %arg2[%c2_72, %c0_73, %c0_74] : memref<6x50x1xf32, #tpu.memory_space<vmem>>, vector<1x50x1xf32>
    %106 = vector.shape_cast %105 : vector<1x50x1xf32> to vector<50x1xf32>
    %107 = vector.broadcast %106 : vector<50x1xf32> to vector<50x128xf32>
    %108 = vector.broadcast %99 : vector<1x128xf32> to vector<50x128xf32>
    %109 = arith.mulf %107, %108 : vector<50x128xf32>
    %c2_75 = arith.constant 2 : index
    %c0_76 = arith.constant 0 : index
    %c0_77 = arith.constant 0 : index
    %c0_78 = arith.constant 0 : index
    %110 = vector.load %arg5[%c2_75, %c0_76, %c0_77, %c0_78] : memref<6x3x50x1xf32, #tpu.memory_space<vmem>>, vector<1x1x50x1xf32>
    %111 = vector.shape_cast %110 : vector<1x1x50x1xf32> to vector<50x1xf32>
    %112 = vector.broadcast %111 : vector<50x1xf32> to vector<50x128xf32>
    %113 = arith.addf %109, %112 : vector<50x128xf32>
    %cst_79 = arith.constant 0.000000e+00 : f32
    %114 = vector.broadcast %cst_79 : f32 to vector<50x128xf32>
    %115 = arith.maximumf %113, %114 : vector<50x128xf32>
    %c2_80 = arith.constant 2 : index
    %c0_81 = arith.constant 0 : index
    %c0_82 = arith.constant 0 : index
    %c0_83 = arith.constant 0 : index
    %116 = vector.load %arg3[%c2_80, %c0_81, %c0_82, %c0_83] : memref<6x2x50x50xbf16, #tpu.memory_space<vmem>>, vector<1x1x50x50xbf16>
    %117 = vector.shape_cast %116 : vector<1x1x50x50xbf16> to vector<50x50xbf16>
    %118 = arith.truncf %115 : vector<50x128xf32> to vector<50x128xbf16>
    %cst_84 = arith.constant dense<0.000000e+00> : vector<50x128xf32>
    %119 = tpu.matmul %117, %118, %cst_84 {dimension_numbers = #tpu.dot_dimension_numbers<[1], [0], [0], [1], [0, 0, 1, 1], [], []>} : vector<50x50xbf16>, vector<50x128xbf16>, vector<50x128xf32> -> vector<50x128xf32>
    %c2_85 = arith.constant 2 : index
    %c1_86 = arith.constant 1 : index
    %c0_87 = arith.constant 0 : index
    %c0_88 = arith.constant 0 : index
    %120 = vector.load %arg5[%c2_85, %c1_86, %c0_87, %c0_88] : memref<6x3x50x1xf32, #tpu.memory_space<vmem>>, vector<1x1x50x1xf32>
    %121 = vector.shape_cast %120 : vector<1x1x50x1xf32> to vector<50x1xf32>
    %122 = vector.broadcast %121 : vector<50x1xf32> to vector<50x128xf32>
    %123 = arith.addf %119, %122 : vector<50x128xf32>
    %cst_89 = arith.constant 0.000000e+00 : f32
    %124 = vector.broadcast %cst_89 : f32 to vector<50x128xf32>
    %125 = arith.maximumf %123, %124 : vector<50x128xf32>
    %c2_90 = arith.constant 2 : index
    %c1_91 = arith.constant 1 : index
    %c0_92 = arith.constant 0 : index
    %c0_93 = arith.constant 0 : index
    %126 = vector.load %arg3[%c2_90, %c1_91, %c0_92, %c0_93] : memref<6x2x50x50xbf16, #tpu.memory_space<vmem>>, vector<1x1x50x50xbf16>
    %127 = vector.shape_cast %126 : vector<1x1x50x50xbf16> to vector<50x50xbf16>
    %128 = arith.truncf %125 : vector<50x128xf32> to vector<50x128xbf16>
    %cst_94 = arith.constant dense<0.000000e+00> : vector<50x128xf32>
    %129 = tpu.matmul %127, %128, %cst_94 {dimension_numbers = #tpu.dot_dimension_numbers<[1], [0], [0], [1], [0, 0, 1, 1], [], []>} : vector<50x50xbf16>, vector<50x128xbf16>, vector<50x128xf32> -> vector<50x128xf32>
    %c2_95 = arith.constant 2 : index
    %c2_96 = arith.constant 2 : index
    %c0_97 = arith.constant 0 : index
    %c0_98 = arith.constant 0 : index
    %130 = vector.load %arg5[%c2_95, %c2_96, %c0_97, %c0_98] : memref<6x3x50x1xf32, #tpu.memory_space<vmem>>, vector<1x1x50x1xf32>
    %131 = vector.shape_cast %130 : vector<1x1x50x1xf32> to vector<50x1xf32>
    %132 = vector.broadcast %131 : vector<50x1xf32> to vector<50x128xf32>
    %133 = arith.addf %129, %132 : vector<50x128xf32>
    %cst_99 = arith.constant 0.000000e+00 : f32
    %134 = vector.broadcast %cst_99 : f32 to vector<50x128xf32>
    %135 = arith.maximumf %133, %134 : vector<50x128xf32>
    %c2_100 = arith.constant 2 : index
    %c0_101 = arith.constant 0 : index
    %c0_102 = arith.constant 0 : index
    %136 = vector.load %arg4[%c2_100, %c0_101, %c0_102] : memref<6x4x50xbf16, #tpu.memory_space<vmem>>, vector<1x4x50xbf16>
    %137 = vector.shape_cast %136 : vector<1x4x50xbf16> to vector<4x50xbf16>
    %138 = arith.truncf %135 : vector<50x128xf32> to vector<50x128xbf16>
    %cst_103 = arith.constant dense<0.000000e+00> : vector<4x128xf32>
    %139 = tpu.matmul %137, %138, %cst_103 {dimension_numbers = #tpu.dot_dimension_numbers<[1], [0], [0], [1], [0, 0, 1, 1], [], []>} : vector<4x50xbf16>, vector<50x128xbf16>, vector<4x128xf32> -> vector<4x128xf32>
    %c2_104 = arith.constant 2 : index
    %c0_105 = arith.constant 0 : index
    %c0_106 = arith.constant 0 : index
    %140 = vector.load %arg6[%c2_104, %c0_105, %c0_106] : memref<6x4x1xf32, #tpu.memory_space<vmem>>, vector<1x4x1xf32>
    %141 = vector.shape_cast %140 : vector<1x4x1xf32> to vector<4x1xf32>
    %142 = vector.broadcast %141 : vector<4x1xf32> to vector<4x128xf32>
    %143 = arith.addf %139, %142 : vector<4x128xf32>
    %144 = vector.extract_strided_slice %143 {offsets = [0, 0], sizes = [2, 128], strides = [1, 1]} : vector<4x128xf32> to vector<2x128xf32>
    %145 = vector.extract_strided_slice %143 {offsets = [2, 0], sizes = [2, 128], strides = [1, 1]} : vector<4x128xf32> to vector<2x128xf32>
    %146 = vector.extract_strided_slice %145 {offsets = [0, 0], sizes = [1, 128], strides = [1, 1]} : vector<2x128xf32> to vector<1x128xf32>
    %147 = math.exp %146 : vector<1x128xf32>
    %148 = arith.mulf %104, %147 : vector<1x128xf32>
    %149 = vector.extract_strided_slice %144 {offsets = [0, 0], sizes = [1, 128], strides = [1, 1]} : vector<2x128xf32> to vector<1x128xf32>
    %150 = arith.addf %148, %149 : vector<1x128xf32>
    %151 = vector.extract_strided_slice %145 {offsets = [1, 0], sizes = [1, 128], strides = [1, 1]} : vector<2x128xf32> to vector<1x128xf32>
    %152 = math.exp %151 : vector<1x128xf32>
    %153 = arith.mulf %0, %152 : vector<1x128xf32>
    %154 = vector.extract_strided_slice %144 {offsets = [1, 0], sizes = [1, 128], strides = [1, 1]} : vector<2x128xf32> to vector<1x128xf32>
    %155 = arith.addf %153, %154 : vector<1x128xf32>
    %c3 = arith.constant 3 : index
    %c0_107 = arith.constant 0 : index
    %c0_108 = arith.constant 0 : index
    %156 = vector.load %arg2[%c3, %c0_107, %c0_108] : memref<6x50x1xf32, #tpu.memory_space<vmem>>, vector<1x50x1xf32>
    %157 = vector.shape_cast %156 : vector<1x50x1xf32> to vector<50x1xf32>
    %158 = vector.broadcast %157 : vector<50x1xf32> to vector<50x128xf32>
    %159 = vector.broadcast %155 : vector<1x128xf32> to vector<50x128xf32>
    %160 = arith.mulf %158, %159 : vector<50x128xf32>
    %c3_109 = arith.constant 3 : index
    %c0_110 = arith.constant 0 : index
    %c0_111 = arith.constant 0 : index
    %c0_112 = arith.constant 0 : index
    %161 = vector.load %arg5[%c3_109, %c0_110, %c0_111, %c0_112] : memref<6x3x50x1xf32, #tpu.memory_space<vmem>>, vector<1x1x50x1xf32>
    %162 = vector.shape_cast %161 : vector<1x1x50x1xf32> to vector<50x1xf32>
    %163 = vector.broadcast %162 : vector<50x1xf32> to vector<50x128xf32>
    %164 = arith.addf %160, %163 : vector<50x128xf32>
    %cst_113 = arith.constant 0.000000e+00 : f32
    %165 = vector.broadcast %cst_113 : f32 to vector<50x128xf32>
    %166 = arith.maximumf %164, %165 : vector<50x128xf32>
    %c3_114 = arith.constant 3 : index
    %c0_115 = arith.constant 0 : index
    %c0_116 = arith.constant 0 : index
    %c0_117 = arith.constant 0 : index
    %167 = vector.load %arg3[%c3_114, %c0_115, %c0_116, %c0_117] : memref<6x2x50x50xbf16, #tpu.memory_space<vmem>>, vector<1x1x50x50xbf16>
    %168 = vector.shape_cast %167 : vector<1x1x50x50xbf16> to vector<50x50xbf16>
    %169 = arith.truncf %166 : vector<50x128xf32> to vector<50x128xbf16>
    %cst_118 = arith.constant dense<0.000000e+00> : vector<50x128xf32>
    %170 = tpu.matmul %168, %169, %cst_118 {dimension_numbers = #tpu.dot_dimension_numbers<[1], [0], [0], [1], [0, 0, 1, 1], [], []>} : vector<50x50xbf16>, vector<50x128xbf16>, vector<50x128xf32> -> vector<50x128xf32>
    %c3_119 = arith.constant 3 : index
    %c1_120 = arith.constant 1 : index
    %c0_121 = arith.constant 0 : index
    %c0_122 = arith.constant 0 : index
    %171 = vector.load %arg5[%c3_119, %c1_120, %c0_121, %c0_122] : memref<6x3x50x1xf32, #tpu.memory_space<vmem>>, vector<1x1x50x1xf32>
    %172 = vector.shape_cast %171 : vector<1x1x50x1xf32> to vector<50x1xf32>
    %173 = vector.broadcast %172 : vector<50x1xf32> to vector<50x128xf32>
    %174 = arith.addf %170, %173 : vector<50x128xf32>
    %cst_123 = arith.constant 0.000000e+00 : f32
    %175 = vector.broadcast %cst_123 : f32 to vector<50x128xf32>
    %176 = arith.maximumf %174, %175 : vector<50x128xf32>
    %c3_124 = arith.constant 3 : index
    %c1_125 = arith.constant 1 : index
    %c0_126 = arith.constant 0 : index
    %c0_127 = arith.constant 0 : index
    %177 = vector.load %arg3[%c3_124, %c1_125, %c0_126, %c0_127] : memref<6x2x50x50xbf16, #tpu.memory_space<vmem>>, vector<1x1x50x50xbf16>
    %178 = vector.shape_cast %177 : vector<1x1x50x50xbf16> to vector<50x50xbf16>
    %179 = arith.truncf %176 : vector<50x128xf32> to vector<50x128xbf16>
    %cst_128 = arith.constant dense<0.000000e+00> : vector<50x128xf32>
    %180 = tpu.matmul %178, %179, %cst_128 {dimension_numbers = #tpu.dot_dimension_numbers<[1], [0], [0], [1], [0, 0, 1, 1], [], []>} : vector<50x50xbf16>, vector<50x128xbf16>, vector<50x128xf32> -> vector<50x128xf32>
    %c3_129 = arith.constant 3 : index
    %c2_130 = arith.constant 2 : index
    %c0_131 = arith.constant 0 : index
    %c0_132 = arith.constant 0 : index
    %181 = vector.load %arg5[%c3_129, %c2_130, %c0_131, %c0_132] : memref<6x3x50x1xf32, #tpu.memory_space<vmem>>, vector<1x1x50x1xf32>
    %182 = vector.shape_cast %181 : vector<1x1x50x1xf32> to vector<50x1xf32>
    %183 = vector.broadcast %182 : vector<50x1xf32> to vector<50x128xf32>
    %184 = arith.addf %180, %183 : vector<50x128xf32>
    %cst_133 = arith.constant 0.000000e+00 : f32
    %185 = vector.broadcast %cst_133 : f32 to vector<50x128xf32>
    %186 = arith.maximumf %184, %185 : vector<50x128xf32>
    %c3_134 = arith.constant 3 : index
    %c0_135 = arith.constant 0 : index
    %c0_136 = arith.constant 0 : index
    %187 = vector.load %arg4[%c3_134, %c0_135, %c0_136] : memref<6x4x50xbf16, #tpu.memory_space<vmem>>, vector<1x4x50xbf16>
    %188 = vector.shape_cast %187 : vector<1x4x50xbf16> to vector<4x50xbf16>
    %189 = arith.truncf %186 : vector<50x128xf32> to vector<50x128xbf16>
    %cst_137 = arith.constant dense<0.000000e+00> : vector<4x128xf32>
    %190 = tpu.matmul %188, %189, %cst_137 {dimension_numbers = #tpu.dot_dimension_numbers<[1], [0], [0], [1], [0, 0, 1, 1], [], []>} : vector<4x50xbf16>, vector<50x128xbf16>, vector<4x128xf32> -> vector<4x128xf32>
    %c3_138 = arith.constant 3 : index
    %c0_139 = arith.constant 0 : index
    %c0_140 = arith.constant 0 : index
    %191 = vector.load %arg6[%c3_138, %c0_139, %c0_140] : memref<6x4x1xf32, #tpu.memory_space<vmem>>, vector<1x4x1xf32>
    %192 = vector.shape_cast %191 : vector<1x4x1xf32> to vector<4x1xf32>
    %193 = vector.broadcast %192 : vector<4x1xf32> to vector<4x128xf32>
    %194 = arith.addf %190, %193 : vector<4x128xf32>
    %195 = vector.extract_strided_slice %194 {offsets = [0, 0], sizes = [2, 128], strides = [1, 1]} : vector<4x128xf32> to vector<2x128xf32>
    %196 = vector.extract_strided_slice %194 {offsets = [2, 0], sizes = [2, 128], strides = [1, 1]} : vector<4x128xf32> to vector<2x128xf32>
    %197 = vector.extract_strided_slice %196 {offsets = [0, 0], sizes = [1, 128], strides = [1, 1]} : vector<2x128xf32> to vector<1x128xf32>
    %198 = math.exp %197 : vector<1x128xf32>
    %199 = arith.mulf %99, %198 : vector<1x128xf32>
    %200 = vector.extract_strided_slice %195 {offsets = [0, 0], sizes = [1, 128], strides = [1, 1]} : vector<2x128xf32> to vector<1x128xf32>
    %201 = arith.addf %199, %200 : vector<1x128xf32>
    %202 = vector.extract_strided_slice %196 {offsets = [1, 0], sizes = [1, 128], strides = [1, 1]} : vector<2x128xf32> to vector<1x128xf32>
    %203 = math.exp %202 : vector<1x128xf32>
    %204 = arith.mulf %150, %203 : vector<1x128xf32>
    %205 = vector.extract_strided_slice %195 {offsets = [1, 0], sizes = [1, 128], strides = [1, 1]} : vector<2x128xf32> to vector<1x128xf32>
    %206 = arith.addf %204, %205 : vector<1x128xf32>
    %c4 = arith.constant 4 : index
    %c0_141 = arith.constant 0 : index
    %c0_142 = arith.constant 0 : index
    %207 = vector.load %arg2[%c4, %c0_141, %c0_142] : memref<6x50x1xf32, #tpu.memory_space<vmem>>, vector<1x50x1xf32>
    %208 = vector.shape_cast %207 : vector<1x50x1xf32> to vector<50x1xf32>
    %209 = vector.broadcast %208 : vector<50x1xf32> to vector<50x128xf32>
    %210 = vector.broadcast %155 : vector<1x128xf32> to vector<50x128xf32>
    %211 = arith.mulf %209, %210 : vector<50x128xf32>
    %c4_143 = arith.constant 4 : index
    %c0_144 = arith.constant 0 : index
    %c0_145 = arith.constant 0 : index
    %c0_146 = arith.constant 0 : index
    %212 = vector.load %arg5[%c4_143, %c0_144, %c0_145, %c0_146] : memref<6x3x50x1xf32, #tpu.memory_space<vmem>>, vector<1x1x50x1xf32>
    %213 = vector.shape_cast %212 : vector<1x1x50x1xf32> to vector<50x1xf32>
    %214 = vector.broadcast %213 : vector<50x1xf32> to vector<50x128xf32>
    %215 = arith.addf %211, %214 : vector<50x128xf32>
    %cst_147 = arith.constant 0.000000e+00 : f32
    %216 = vector.broadcast %cst_147 : f32 to vector<50x128xf32>
    %217 = arith.maximumf %215, %216 : vector<50x128xf32>
    %c4_148 = arith.constant 4 : index
    %c0_149 = arith.constant 0 : index
    %c0_150 = arith.constant 0 : index
    %c0_151 = arith.constant 0 : index
    %218 = vector.load %arg3[%c4_148, %c0_149, %c0_150, %c0_151] : memref<6x2x50x50xbf16, #tpu.memory_space<vmem>>, vector<1x1x50x50xbf16>
    %219 = vector.shape_cast %218 : vector<1x1x50x50xbf16> to vector<50x50xbf16>
    %220 = arith.truncf %217 : vector<50x128xf32> to vector<50x128xbf16>
    %cst_152 = arith.constant dense<0.000000e+00> : vector<50x128xf32>
    %221 = tpu.matmul %219, %220, %cst_152 {dimension_numbers = #tpu.dot_dimension_numbers<[1], [0], [0], [1], [0, 0, 1, 1], [], []>} : vector<50x50xbf16>, vector<50x128xbf16>, vector<50x128xf32> -> vector<50x128xf32>
    %c4_153 = arith.constant 4 : index
    %c1_154 = arith.constant 1 : index
    %c0_155 = arith.constant 0 : index
    %c0_156 = arith.constant 0 : index
    %222 = vector.load %arg5[%c4_153, %c1_154, %c0_155, %c0_156] : memref<6x3x50x1xf32, #tpu.memory_space<vmem>>, vector<1x1x50x1xf32>
    %223 = vector.shape_cast %222 : vector<1x1x50x1xf32> to vector<50x1xf32>
    %224 = vector.broadcast %223 : vector<50x1xf32> to vector<50x128xf32>
    %225 = arith.addf %221, %224 : vector<50x128xf32>
    %cst_157 = arith.constant 0.000000e+00 : f32
    %226 = vector.broadcast %cst_157 : f32 to vector<50x128xf32>
    %227 = arith.maximumf %225, %226 : vector<50x128xf32>
    %c4_158 = arith.constant 4 : index
    %c1_159 = arith.constant 1 : index
    %c0_160 = arith.constant 0 : index
    %c0_161 = arith.constant 0 : index
    %228 = vector.load %arg3[%c4_158, %c1_159, %c0_160, %c0_161] : memref<6x2x50x50xbf16, #tpu.memory_space<vmem>>, vector<1x1x50x50xbf16>
    %229 = vector.shape_cast %228 : vector<1x1x50x50xbf16> to vector<50x50xbf16>
    %230 = arith.truncf %227 : vector<50x128xf32> to vector<50x128xbf16>
    %cst_162 = arith.constant dense<0.000000e+00> : vector<50x128xf32>
    %231 = tpu.matmul %229, %230, %cst_162 {dimension_numbers = #tpu.dot_dimension_numbers<[1], [0], [0], [1], [0, 0, 1, 1], [], []>} : vector<50x50xbf16>, vector<50x128xbf16>, vector<50x128xf32> -> vector<50x128xf32>
    %c4_163 = arith.constant 4 : index
    %c2_164 = arith.constant 2 : index
    %c0_165 = arith.constant 0 : index
    %c0_166 = arith.constant 0 : index
    %232 = vector.load %arg5[%c4_163, %c2_164, %c0_165, %c0_166] : memref<6x3x50x1xf32, #tpu.memory_space<vmem>>, vector<1x1x50x1xf32>
    %233 = vector.shape_cast %232 : vector<1x1x50x1xf32> to vector<50x1xf32>
    %234 = vector.broadcast %233 : vector<50x1xf32> to vector<50x128xf32>
    %235 = arith.addf %231, %234 : vector<50x128xf32>
    %cst_167 = arith.constant 0.000000e+00 : f32
    %236 = vector.broadcast %cst_167 : f32 to vector<50x128xf32>
    %237 = arith.maximumf %235, %236 : vector<50x128xf32>
    %c4_168 = arith.constant 4 : index
    %c0_169 = arith.constant 0 : index
    %c0_170 = arith.constant 0 : index
    %238 = vector.load %arg4[%c4_168, %c0_169, %c0_170] : memref<6x4x50xbf16, #tpu.memory_space<vmem>>, vector<1x4x50xbf16>
    %239 = vector.shape_cast %238 : vector<1x4x50xbf16> to vector<4x50xbf16>
    %240 = arith.truncf %237 : vector<50x128xf32> to vector<50x128xbf16>
    %cst_171 = arith.constant dense<0.000000e+00> : vector<4x128xf32>
    %241 = tpu.matmul %239, %240, %cst_171 {dimension_numbers = #tpu.dot_dimension_numbers<[1], [0], [0], [1], [0, 0, 1, 1], [], []>} : vector<4x50xbf16>, vector<50x128xbf16>, vector<4x128xf32> -> vector<4x128xf32>
    %c4_172 = arith.constant 4 : index
    %c0_173 = arith.constant 0 : index
    %c0_174 = arith.constant 0 : index
    %242 = vector.load %arg6[%c4_172, %c0_173, %c0_174] : memref<6x4x1xf32, #tpu.memory_space<vmem>>, vector<1x4x1xf32>
    %243 = vector.shape_cast %242 : vector<1x4x1xf32> to vector<4x1xf32>
    %244 = vector.broadcast %243 : vector<4x1xf32> to vector<4x128xf32>
    %245 = arith.addf %241, %244 : vector<4x128xf32>
    %246 = vector.extract_strided_slice %245 {offsets = [0, 0], sizes = [2, 128], strides = [1, 1]} : vector<4x128xf32> to vector<2x128xf32>
    %247 = vector.extract_strided_slice %245 {offsets = [2, 0], sizes = [2, 128], strides = [1, 1]} : vector<4x128xf32> to vector<2x128xf32>
    %248 = vector.extract_strided_slice %247 {offsets = [0, 0], sizes = [1, 128], strides = [1, 1]} : vector<2x128xf32> to vector<1x128xf32>
    %249 = math.exp %248 : vector<1x128xf32>
    %250 = arith.mulf %201, %249 : vector<1x128xf32>
    %251 = vector.extract_strided_slice %246 {offsets = [0, 0], sizes = [1, 128], strides = [1, 1]} : vector<2x128xf32> to vector<1x128xf32>
    %252 = arith.addf %250, %251 : vector<1x128xf32>
    %253 = vector.extract_strided_slice %247 {offsets = [1, 0], sizes = [1, 128], strides = [1, 1]} : vector<2x128xf32> to vector<1x128xf32>
    %254 = math.exp %253 : vector<1x128xf32>
    %255 = arith.mulf %206, %254 : vector<1x128xf32>
    %256 = vector.extract_strided_slice %246 {offsets = [1, 0], sizes = [1, 128], strides = [1, 1]} : vector<2x128xf32> to vector<1x128xf32>
    %257 = arith.addf %255, %256 : vector<1x128xf32>
    %c5 = arith.constant 5 : index
    %c0_175 = arith.constant 0 : index
    %c0_176 = arith.constant 0 : index
    %258 = vector.load %arg2[%c5, %c0_175, %c0_176] : memref<6x50x1xf32, #tpu.memory_space<vmem>>, vector<1x50x1xf32>
    %259 = vector.shape_cast %258 : vector<1x50x1xf32> to vector<50x1xf32>
    %260 = vector.broadcast %259 : vector<50x1xf32> to vector<50x128xf32>
    %261 = vector.broadcast %252 : vector<1x128xf32> to vector<50x128xf32>
    %262 = arith.mulf %260, %261 : vector<50x128xf32>
    %c5_177 = arith.constant 5 : index
    %c0_178 = arith.constant 0 : index
    %c0_179 = arith.constant 0 : index
    %c0_180 = arith.constant 0 : index
    %263 = vector.load %arg5[%c5_177, %c0_178, %c0_179, %c0_180] : memref<6x3x50x1xf32, #tpu.memory_space<vmem>>, vector<1x1x50x1xf32>
    %264 = vector.shape_cast %263 : vector<1x1x50x1xf32> to vector<50x1xf32>
    %265 = vector.broadcast %264 : vector<50x1xf32> to vector<50x128xf32>
    %266 = arith.addf %262, %265 : vector<50x128xf32>
    %cst_181 = arith.constant 0.000000e+00 : f32
    %267 = vector.broadcast %cst_181 : f32 to vector<50x128xf32>
    %268 = arith.maximumf %266, %267 : vector<50x128xf32>
    %c5_182 = arith.constant 5 : index
    %c0_183 = arith.constant 0 : index
    %c0_184 = arith.constant 0 : index
    %c0_185 = arith.constant 0 : index
    %269 = vector.load %arg3[%c5_182, %c0_183, %c0_184, %c0_185] : memref<6x2x50x50xbf16, #tpu.memory_space<vmem>>, vector<1x1x50x50xbf16>
    %270 = vector.shape_cast %269 : vector<1x1x50x50xbf16> to vector<50x50xbf16>
    %271 = arith.truncf %268 : vector<50x128xf32> to vector<50x128xbf16>
    %cst_186 = arith.constant dense<0.000000e+00> : vector<50x128xf32>
    %272 = tpu.matmul %270, %271, %cst_186 {dimension_numbers = #tpu.dot_dimension_numbers<[1], [0], [0], [1], [0, 0, 1, 1], [], []>} : vector<50x50xbf16>, vector<50x128xbf16>, vector<50x128xf32> -> vector<50x128xf32>
    %c5_187 = arith.constant 5 : index
    %c1_188 = arith.constant 1 : index
    %c0_189 = arith.constant 0 : index
    %c0_190 = arith.constant 0 : index
    %273 = vector.load %arg5[%c5_187, %c1_188, %c0_189, %c0_190] : memref<6x3x50x1xf32, #tpu.memory_space<vmem>>, vector<1x1x50x1xf32>
    %274 = vector.shape_cast %273 : vector<1x1x50x1xf32> to vector<50x1xf32>
    %275 = vector.broadcast %274 : vector<50x1xf32> to vector<50x128xf32>
    %276 = arith.addf %272, %275 : vector<50x128xf32>
    %cst_191 = arith.constant 0.000000e+00 : f32
    %277 = vector.broadcast %cst_191 : f32 to vector<50x128xf32>
    %278 = arith.maximumf %276, %277 : vector<50x128xf32>
    %c5_192 = arith.constant 5 : index
    %c1_193 = arith.constant 1 : index
    %c0_194 = arith.constant 0 : index
    %c0_195 = arith.constant 0 : index
    %279 = vector.load %arg3[%c5_192, %c1_193, %c0_194, %c0_195] : memref<6x2x50x50xbf16, #tpu.memory_space<vmem>>, vector<1x1x50x50xbf16>
    %280 = vector.shape_cast %279 : vector<1x1x50x50xbf16> to vector<50x50xbf16>
    %281 = arith.truncf %278 : vector<50x128xf32> to vector<50x128xbf16>
    %cst_196 = arith.constant dense<0.000000e+00> : vector<50x128xf32>
    %282 = tpu.matmul %280, %281, %cst_196 {dimension_numbers = #tpu.dot_dimension_numbers<[1], [0], [0], [1], [0, 0, 1, 1], [], []>} : vector<50x50xbf16>, vector<50x128xbf16>, vector<50x128xf32> -> vector<50x128xf32>
    %c5_197 = arith.constant 5 : index
    %c2_198 = arith.constant 2 : index
    %c0_199 = arith.constant 0 : index
    %c0_200 = arith.constant 0 : index
    %283 = vector.load %arg5[%c5_197, %c2_198, %c0_199, %c0_200] : memref<6x3x50x1xf32, #tpu.memory_space<vmem>>, vector<1x1x50x1xf32>
    %284 = vector.shape_cast %283 : vector<1x1x50x1xf32> to vector<50x1xf32>
    %285 = vector.broadcast %284 : vector<50x1xf32> to vector<50x128xf32>
    %286 = arith.addf %282, %285 : vector<50x128xf32>
    %cst_201 = arith.constant 0.000000e+00 : f32
    %287 = vector.broadcast %cst_201 : f32 to vector<50x128xf32>
    %288 = arith.maximumf %286, %287 : vector<50x128xf32>
    %c5_202 = arith.constant 5 : index
    %c0_203 = arith.constant 0 : index
    %c0_204 = arith.constant 0 : index
    %289 = vector.load %arg4[%c5_202, %c0_203, %c0_204] : memref<6x4x50xbf16, #tpu.memory_space<vmem>>, vector<1x4x50xbf16>
    %290 = vector.shape_cast %289 : vector<1x4x50xbf16> to vector<4x50xbf16>
    %291 = arith.truncf %288 : vector<50x128xf32> to vector<50x128xbf16>
    %cst_205 = arith.constant dense<0.000000e+00> : vector<4x128xf32>
    %292 = tpu.matmul %290, %291, %cst_205 {dimension_numbers = #tpu.dot_dimension_numbers<[1], [0], [0], [1], [0, 0, 1, 1], [], []>} : vector<4x50xbf16>, vector<50x128xbf16>, vector<4x128xf32> -> vector<4x128xf32>
    %c5_206 = arith.constant 5 : index
    %c0_207 = arith.constant 0 : index
    %c0_208 = arith.constant 0 : index
    %293 = vector.load %arg6[%c5_206, %c0_207, %c0_208] : memref<6x4x1xf32, #tpu.memory_space<vmem>>, vector<1x4x1xf32>
    %294 = vector.shape_cast %293 : vector<1x4x1xf32> to vector<4x1xf32>
    %295 = vector.broadcast %294 : vector<4x1xf32> to vector<4x128xf32>
    %296 = arith.addf %292, %295 : vector<4x128xf32>
    %297 = vector.extract_strided_slice %296 {offsets = [0, 0], sizes = [2, 128], strides = [1, 1]} : vector<4x128xf32> to vector<2x128xf32>
    %298 = vector.extract_strided_slice %296 {offsets = [2, 0], sizes = [2, 128], strides = [1, 1]} : vector<4x128xf32> to vector<2x128xf32>
    %299 = vector.extract_strided_slice %298 {offsets = [0, 0], sizes = [1, 128], strides = [1, 1]} : vector<2x128xf32> to vector<1x128xf32>
    %300 = math.exp %299 : vector<1x128xf32>
    %301 = arith.mulf %257, %300 : vector<1x128xf32>
    %302 = vector.extract_strided_slice %297 {offsets = [0, 0], sizes = [1, 128], strides = [1, 1]} : vector<2x128xf32> to vector<1x128xf32>
    %303 = arith.addf %301, %302 : vector<1x128xf32>
    %304 = vector.extract_strided_slice %298 {offsets = [1, 0], sizes = [1, 128], strides = [1, 1]} : vector<2x128xf32> to vector<1x128xf32>
    %305 = math.exp %304 : vector<1x128xf32>
    %306 = arith.mulf %155, %305 : vector<1x128xf32>
    %307 = vector.extract_strided_slice %297 {offsets = [1, 0], sizes = [1, 128], strides = [1, 1]} : vector<2x128xf32> to vector<1x128xf32>
    %308 = arith.addf %306, %307 : vector<1x128xf32>
    %309 = tpu.concatenate %308, %252, %303 in 0 : vector<1x128xf32>, vector<1x128xf32>, vector<1x128xf32> -> vector<3x128xf32>
    %c0_209 = arith.constant 0 : index
    %c0_210 = arith.constant 0 : index
    %310 = vector.load %arg7[%c0_209, %c0_210] : memref<3x128xf32, #tpu.memory_space<vmem>>, vector<3x128xf32>
    tpu.vector_store %arg7[%c0_209, %c0_210], %309 {strides = array<i32>} : memref<3x128xf32, #tpu.memory_space<vmem>>, vector<3x128xf32>,
    return
  }
  func.func @transform_0(%arg0: i32) -> (i32, i32) {
    %c0_i32 = arith.constant 0 : i32
    %c0_i32_0 = arith.constant 0 : i32
    return %c0_i32, %arg0 : i32, i32
  }
  func.func @transform_1(%arg0: i32) -> (i32, i32, i32) {
    %c0_i32 = arith.constant 0 : i32
    %c0_i32_0 = arith.constant 0 : i32
    %c0_i32_1 = arith.constant 0 : i32
    %c0_i32_2 = arith.constant 0 : i32
    return %c0_i32, %c0_i32_0, %c0_i32_1 : i32, i32, i32
  }
  func.func @transform_2(%arg0: i32) -> (i32, i32, i32, i32) {
    %c0_i32 = arith.constant 0 : i32
    %c0_i32_0 = arith.constant 0 : i32
    %c0_i32_1 = arith.constant 0 : i32
    %c0_i32_2 = arith.constant 0 : i32
    %c0_i32_3 = arith.constant 0 : i32
    return %c0_i32, %c0_i32_0, %c0_i32_1, %c0_i32_2 : i32, i32, i32, i32
  }
  func.func @transform_3(%arg0: i32) -> (i32, i32, i32) {
    %c0_i32 = arith.constant 0 : i32
    %c0_i32_0 = arith.constant 0 : i32
    %c0_i32_1 = arith.constant 0 : i32
    %c0_i32_2 = arith.constant 0 : i32
    return %c0_i32, %c0_i32_0, %c0_i32_1 : i32, i32, i32
  }
  func.func @transform_4(%arg0: i32) -> (i32, i32, i32, i32) {
    %c0_i32 = arith.constant 0 : i32
    %c0_i32_0 = arith.constant 0 : i32
    %c0_i32_1 = arith.constant 0 : i32
    %c0_i32_2 = arith.constant 0 : i32
    %c0_i32_3 = arith.constant 0 : i32
    return %c0_i32, %c0_i32_0, %c0_i32_1, %c0_i32_2 : i32, i32, i32, i32
  }
  func.func @transform_5(%arg0: i32) -> (i32, i32, i32) {
    %c0_i32 = arith.constant 0 : i32
    %c0_i32_0 = arith.constant 0 : i32
    %c0_i32_1 = arith.constant 0 : i32
    %c0_i32_2 = arith.constant 0 : i32
    return %c0_i32, %c0_i32_0, %c0_i32_1 : i32, i32, i32
  }
  func.func @transform_6(%arg0: i32) -> (i32, i32) {
    %c0_i32 = arith.constant 0 : i32
    %c0_i32_0 = arith.constant 0 : i32
    return %c0_i32, %arg0 : i32, i32
  }
}

</mosaic_0001>

<bundles_post_ra>
// kernel: flow_forward.1
= control target key start
LH: loop header
LB: loop body
LE: loop exit
PB: predicated region body
PF: predicated region fallthrough
CT: control target
= control target key end

     0   :  { %v3854_v0 = vmov 0   ;;  %vm208_vm0 = vcmask 408576   ;;  %v69_v60 = vlaneseq  ;;  %vm221_vm1 = vcmask 1040384   ;;  %s4961_s4 = inlined_call_operand.vmem [shape: f32[6,3,50,1], index: 4, kind: input, shape index: {}]   ;;  %s4962_s1 = inlined_call_operand.vmem [shape: f32[6,50,1], index: 1, kind: input, shape index: {}]   ;;  %s4963_s2 = inlined_call_operand.vmem [shape: bf16[6,2,50,50], index: 2, kind: input, shape index: {}]   ;;  %s4964_s5 = inlined_call_operand.vmem [shape: f32[6,4,1], index: 5, kind: input, shape index: {}]   ;;  %s4965_s0 = inlined_call_operand.vmem [shape: f32[3,128], index: 0, kind: input, shape index: {}]   ;;  %s4966_s3 = inlined_call_operand.vmem [shape: bf16[6,4,50], index: 3, kind: input, shape index: {}]   ;;  %s4967_s6 = inlined_call_operand.vmem [shape: f32[3,128], index: 6, kind: output, shape index: {}]  }
   0x1   :  { %3791 = vset.pattern.permute.xlu1 %v3854_v0  ;;  %3790 = vset.pattern.permute.xlu0 %v3854_v0  ;;  %v80_v1 = vld [vmem:[%s4961_s4] sm:$0xff]  ;;  %v81_v3 = vld [vmem:[%s4961_s4 + $0x8] sm:$0xff]  ;;  %v30_v5 = vld [vmem:[%s4962_s1 + $0x18] sm:$0xff]  ;;  %vm3856_vm2 = vmmov 0   ;;  %vm3035_vm3 = vcmask 1041408  }
   0x2   :  { %v27_v2 = vld [vmem:[%s4962_s1] sm:$0xff]  ;;  %89 = vperm.xlu1 %3791, %v80_v1   ;;  %v28_v4 = vld [vmem:[%s4962_s1 + $0x8] sm:$0xff]  ;;  %v29_v6 = vld [vmem:[%s4962_s1 + $0x10] sm:$0xff]  ;;  %v70_v63 = vshrl.u32 %v69_v60, 7 }
   0x3   :  { %36 = vperm.xlu0 %3790, %v27_v2   ;;  %v83_v7 = vld [vmem:[%s4961_s4 + $0x18] sm:$0xff]  ;;  %v82_v8 = vld [vmem:[%s4961_s4 + $0x10] sm:$0xff]  ;;  %v32_v9 = vld [vmem:[%s4962_s1 + $0x28] sm:$0xff] }
   0x4   :  { %v31_v10 = vld [vmem:[%s4962_s1 + $0x20] sm:$0xff]  ;;  %v85_v11 = vld [vmem:[%s4961_s4 + $0x28] sm:$0xff]  ;;  %v86_v13 = vld [vmem:[%s4961_s4 + $0x30] sm:$0x3]  ;;  %v4082_v2 = vsub.s32 0, %v70_v63 }
   0x5   :  { %v84_v12 = vld [vmem:[%s4961_s4 + $0x20] sm:$0xff]  ;;  %v33_v14 = vld [vmem:[%s4962_s1 + $0x30] sm:$0x3]  ;;  %v3042_v16 = vld [vmem:[%s4961_s4 + $0x38] sm:$0xff] }
   0x6   :  { %94 = vperm.xlu1 %3791, %v81_v3   ;;  %v3043_v15 = vld [vmem:[%s4961_s4 + $0x40] sm:$0xff]  ;;  %v3045_v17 = vld [vmem:[%s4961_s4 + $0x50] sm:$0xff]  ;;  %v3044_v18 = vld [vmem:[%s4961_s4 + $0x48] sm:$0xff] }
   0x7   :  { %41 = vperm.xlu0 %3790, %v28_v4   ;;  %v3047_v19 = vld [vmem:[%s4961_s4 + $0x60] sm:$0xff]  ;;  %v3046_v20 = vld [vmem:[%s4961_s4 + $0x58] sm:$0xff]  ;;  %v3048_v23 = vld [vmem:[%s4961_s4 + $0x68] sm:$0x3] }
   0x8   :  { %v3792_v21 = vld [vmem:[%s4963_s2] sm:$0xff]   ;;  %v3080_v22 = vld [vmem:[%s4962_s1 + $0x38] sm:$0xff]  ;;  %v3087_v24 = vld [vmem:[%s4961_s4 + $0xa8] sm:$0xff] }
   0x9   :  { %3519 = vmatprep.mubr.msk.bf16.mxu0 %vm208_vm0, %v3792_v21  ;;  %v3081_v25 = vld [vmem:[%s4962_s1 + $0x40] sm:$0xff]  ;;  %v3082_v26 = vld [vmem:[%s4962_s1 + $0x48] sm:$0xff]  ;;  %v3088_v27 = vld [vmem:[%s4961_s4 + $0xb0] sm:$0xff] }
   0xa   :  { %51 = vperm.xlu1 %3791, %v30_v5   ;;  %v3089_v28 = vld [vmem:[%s4961_s4 + $0xb8] sm:$0xff]  ;;  %v3083_v29 = vld [vmem:[%s4962_s1 + $0x50] sm:$0xff]  ;;  %v3090_v31 = vld [vmem:[%s4961_s4 + $0xc0] sm:$0xff] }
   0xb   :  { %46 = vperm.xlu0 %3790, %v29_v6   ;;  %v3084_v30 = vld [vmem:[%s4962_s1 + $0x58] sm:$0xff]  ;;  %v3091_v32 = vld [vmem:[%s4961_s4 + $0xc8] sm:$0xff]  ;;  %v3085_v33 = vld [vmem:[%s4962_s1 + $0x60] sm:$0xff] }
   0xc   :  { %v3086_v34 = vld [vmem:[%s4962_s1 + $0x68] sm:$0x3]  ;;  %v3092_v35 = vld [vmem:[%s4961_s4 + $0xd0] sm:$0xff]  ;;  %v3093_v37 = vld [vmem:[%s4961_s4 + $0xd8] sm:$0x3] }
   0xd   :  { %v3064_v36 = vld [vmem:[%s4961_s4 + $0x70] sm:$0xff]  ;;  %v3066_v38 = vld [vmem:[%s4961_s4 + $0x80] sm:$0xff]  ;;  %v3065_v39 = vld [vmem:[%s4961_s4 + $0x78] sm:$0xff] }
   0xe   :  { %104 = vperm.xlu1 %3791, %v83_v7   ;;  %v3068_v40 = vld [vmem:[%s4961_s4 + $0x90] sm:$0xff]  ;;  %v3067_v41 = vld [vmem:[%s4961_s4 + $0x88] sm:$0xff]  ;;  %v3070_v42 = vld [vmem:[%s4961_s4 + $0xa0] sm:$0x3] }
   0xf   :  { %99 = vperm.xlu0 %3790, %v82_v8   ;;  %v3069_v43 = vld [vmem:[%s4961_s4 + $0x98] sm:$0xff]  ;;  %v3102_v44 = vld [vmem:[%s4961_s4 + $0xe8] sm:$0xff]  ;;  %v3101_v45 = vld [vmem:[%s4961_s4 + $0xe0] sm:$0xff] }
  0x10   :  { %v3104_v46 = vld [vmem:[%s4961_s4 + $0xf8] sm:$0xff]  ;;  %v3103_v47 = vld [vmem:[%s4961_s4 + $0xf0] sm:$0xff]  ;;  %v3106_v48 = vld [vmem:[%s4961_s4 + $0x108] sm:$0xff] }
  0x11   :  { %v3105_v49 = vld [vmem:[%s4961_s4 + $0x100] sm:$0xff]  ;;  %v3123_v50 = vld [vmem:[%s4961_s4 + $0x118] sm:$0xff]  ;;  %v3107_v51 = vld [vmem:[%s4961_s4 + $0x110] sm:$0x3] }
  0x12   :  { %61 = vperm.xlu1 %3791, %v32_v9   ;;  %v3125_v52 = vld [vmem:[%s4961_s4 + $0x128] sm:$0xff]  ;;  %v3124_v53 = vld [vmem:[%s4961_s4 + $0x120] sm:$0xff]  ;;  %v3127_v54 = vld [vmem:[%s4961_s4 + $0x138] sm:$0xff] }
  0x13   :  { %56 = vperm.xlu0 %3790, %v31_v10   ;;  %v3126_v55 = vld [vmem:[%s4961_s4 + $0x130] sm:$0xff]  ;;  %v3129_v56 = vld [vmem:[%s4961_s4 + $0x148] sm:$0x3]  ;;  %v3128_v57 = vld [vmem:[%s4961_s4 + $0x140] sm:$0xff] }
  0x14   :  { %v3139_v58 = vld [vmem:[%s4964_s5 + $0x4] sm:$0xf]  ;;  %v460_v59 = vld [vmem:[%s4964_s5] sm:$0xf]  ;;  %v3142_v61 = vld [vmem:[%s4962_s1 + $0x78] sm:$0xff] }
  0x15   :  { %v3141_v62 = vld [vmem:[%s4962_s1 + $0x70] sm:$0xff]  ;;  %v3149_v0 = vld [vmem:[%s4961_s4 + $0x158] sm:$0xff]  ;;  %v3144_v3 = vld [vmem:[%s4962_s1 + $0x88] sm:$0xff] }
  0x16   :  { %114 = vperm.xlu1 %3791, %v85_v11   ;;  %v3148_v1 = vld [vmem:[%s4961_s4 + $0x150] sm:$0xff]  ;;  %v3143_v4 = vld [vmem:[%s4962_s1 + $0x80] sm:$0xff]  ;;  %v3151_v6 = vld [vmem:[%s4961_s4 + $0x168] sm:$0xff] }
  0x17   :  { %109 = vperm.xlu0 %3790, %v84_v12   ;;  %v4093_v5 = vld [vmem:[%s4965_s0] ss:$0 sm:$0xff]  ;;  %v3146_v11 = vld [vmem:[%s4962_s1 + $0x98] sm:$0xff]  ;;  %v3145_v12 = vld [vmem:[%s4962_s1 + $0x90] sm:$0xff] }
  0x18   :  { %v3150_v7 = vld [vmem:[%s4961_s4 + $0x160] sm:$0xff]  ;;  %v3186_v60 = vld [vmem:[%s4961_s4 + $0x1d0] sm:$0xff] }
  0x1a   :  { %119 = vperm.xlu1 %3791, %v86_v13  }
  0x1b   :  { %66 = vperm.xlu0 %3790, %v33_v14  }
  0x1e   :  { %162 = vperm.xlu1 %3791, %v3043_v15  }
  0x1f   :  { %157 = vperm.xlu0 %3790, %v3042_v16  }
  0x22   :  { %172 = vperm.xlu1 %3791, %v3045_v17   ;;  %v3153_v17 = vld [vmem:[%s4961_s4 + $0x178] sm:$0xff] }
  0x23   :  { %167 = vperm.xlu0 %3790, %v3044_v18   ;;  %v3152_v18 = vld [vmem:[%s4961_s4 + $0x170] sm:$0xff] }
  0x26   :  { %182 = vperm.xlu1 %3791, %v3047_v19  }
  0x27   :  { %177 = vperm.xlu0 %3790, %v3046_v20  }
  0x2a   :  { %536 = vperm.xlu1 %3791, %v3080_v22  }
  0x2b   :  { %187 = vperm.xlu0 %3790, %v3048_v23  }
  0x2e   :  { %586 = vperm.xlu1 %3791, %v3087_v24   ;;  %v3154_v24 = vld [vmem:[%s4961_s4 + $0x180] sm:$0x3] }
  0x2f   :  { %541 = vperm.xlu0 %3790, %v3081_v25   ;;  %v3147_v25 = vld [vmem:[%s4962_s1 + $0xa0] sm:$0x3] }
  0x32   :  { %546 = vperm.xlu1 %3791, %v3082_v26  }
  0x33   :  { %591 = vperm.xlu0 %3790, %v3088_v27  }
  0x36   :  { %596 = vperm.xlu1 %3791, %v3089_v28  }
  0x37   :  { %551 = vperm.xlu0 %3790, %v3083_v29  }
  0x3a   :  { %556 = vperm.xlu1 %3791, %v3084_v30  }
  0x3b   :  { %601 = vperm.xlu0 %3790, %v3090_v31  }
  0x3e   :  { %606 = vperm.xlu1 %3791, %v3091_v32  }
  0x3f   :  { %561 = vperm.xlu0 %3790, %v3085_v33   ;;  %v3163_v33 = vld [vmem:[%s4961_s4 + $0x190] sm:$0xff] }
  0x42   :  { %566 = vperm.xlu1 %3791, %v3086_v34   ;;  %v3162_v34 = vld [vmem:[%s4961_s4 + $0x188] sm:$0xff] }
  0x43   :  { %611 = vperm.xlu0 %3790, %v3092_v35  }
  0x46   :  { %318 = vperm.xlu1 %3791, %v3064_v36  }
  0x47   :  { %616 = vperm.xlu0 %3790, %v3093_v37  }
  0x4a   :  { %328 = vperm.xlu1 %3791, %v3066_v38  }
  0x4b   :  { %323 = vperm.xlu0 %3790, %v3065_v39  }
  0x4e   :  { %338 = vperm.xlu1 %3791, %v3068_v40   ;;  %v3165_v40 = vld [vmem:[%s4961_s4 + $0x1a0] sm:$0xff] }
  0x4f   :  { %333 = vperm.xlu0 %3790, %v3067_v41   ;;  %v3164_v41 = vld [vmem:[%s4961_s4 + $0x198] sm:$0xff] }
  0x52   :  { %348 = vperm.xlu1 %3791, %v3070_v42  }
  0x53   :  { %343 = vperm.xlu0 %3790, %v3069_v43  }
  0x56   :  { %660 = vperm.xlu1 %3791, %v3102_v44  }
  0x57   :  { %655 = vperm.xlu0 %3790, %v3101_v45  }
  0x5a   :  { %670 = vperm.xlu1 %3791, %v3104_v46  }
  0x5b   :  { %665 = vperm.xlu0 %3790, %v3103_v47  }
  0x5e   :  { %680 = vperm.xlu1 %3791, %v3106_v48   ;;  %v3167_v48 = vld [vmem:[%s4961_s4 + $0x1b0] sm:$0xff] }
  0x5f   :  { %675 = vperm.xlu0 %3790, %v3105_v49   ;;  %v3166_v49 = vld [vmem:[%s4961_s4 + $0x1a8] sm:$0xff] }
  0x62   :  { %814 = vperm.xlu1 %3791, %v3123_v50  }
  0x63   :  { %685 = vperm.xlu0 %3790, %v3107_v51  }
  0x66   :  { %824 = vperm.xlu1 %3791, %v3125_v52  }
  0x67   :  { %819 = vperm.xlu0 %3790, %v3124_v53  }
  0x6a   :  { %834 = vperm.xlu1 %3791, %v3127_v54  }
  0x6b   :  { %829 = vperm.xlu0 %3790, %v3126_v55  }
  0x6e   :  { %844 = vperm.xlu1 %3791, %v3129_v56   ;;  %v3184_v56 = vld [vmem:[%s4961_s4 + $0x1c0] sm:$0xff] }
  0x6f   :  { %839 = vperm.xlu0 %3790, %v3128_v57   ;;  %v3168_v57 = vld [vmem:[%s4961_s4 + $0x1b8] sm:$0x3] }
  0x72   :  { %961 = vperm.xlu1 %3791, %v3139_v58  }
  0x73   :  { %463 = vperm.xlu0 %3790, %v460_v59  }
  0x76   :  { %1039 = vperm.xlu1 %3791, %v3142_v61   ;;  %v3185_v61 = vld [vmem:[%s4961_s4 + $0x1c8] sm:$0xff] }
  0x77   :  { %1034 = vperm.xlu0 %3790, %v3141_v62  }
  0x7a   :  { %1093 = vperm.xlu1 %3791, %v3149_v0   ;;  %v3188_v0 = vld [vmem:[%s4961_s4 + $0x1e0] sm:$0xff] }
  0x7b   :  { %1088 = vperm.xlu0 %3790, %v3148_v1   ;;  %v3187_v1 = vld [vmem:[%s4961_s4 + $0x1d8] sm:$0xff] }
  0x7e   :  { %1049 = vperm.xlu1 %3791, %v3144_v3   ;;  %v3793_v3 = vld [vmem:[%s4963_s2 + $0x8] sm:$0xff]  }
  0x7f   :  { %1044 = vperm.xlu0 %3790, %v3143_v4   ;;  %v3794_v4 = vld [vmem:[%s4963_s2 + $0x10] sm:$0xff]  }
  0x81   :  { %v90_v8 = vpop.permute.xlu1 %89 }
  0x82   :  { %v37_v9 = vpop.permute.xlu0 %36  ;;  %1103 = vperm.xlu1 %3791, %v3151_v6  }
  0x83   :  { %v73_v10 = vmul.f32 %v4093_v5, %v37_v9  ;;  %1098 = vperm.xlu0 %3790, %v3150_v7   ;;  %v3189_v9 = vld [vmem:[%s4961_s4 + $0x1e8] sm:$0xff] }
  0x85   :  { %v95_v13 = vpop.permute.xlu1 %94  ;;  %v122_v15 = vadd.f32 %v90_v8, %v73_v10  ;;  %v3190_v8 = vld [vmem:[%s4961_s4 + $0x1f0] sm:$0x3]  ;;  %v3202_v10 = vld [vmem:[%s4962_s1 + $0xa8] sm:$0xff] }
  0x86   :  { %v42_v14 = vpop.permute.xlu0 %41  ;;  %1059 = vperm.xlu1 %3791, %v3146_v11   ;;  %v3200_v11 = vld [vmem:[%s4964_s5 + $0x8] sm:$0xf] }
  0x87   :  { %v74_v16 = vmul.f32 %v4093_v5, %v42_v14  ;;  %1054 = vperm.xlu0 %3790, %v3145_v12   ;;  %v129_v22 = vmax.f32 %v122_v15, 0.0  ;;  %v3795_v12 = vld [vmem:[%s4963_s2 + $0x18] ss:$0 sps:$4 sm:$0x11]  }
  0x88   :  { %v3209_v15 = vld [vmem:[%s4961_s4 + $0x1f8] sm:$0xff] }
  0x89   :  { %v123_v19 = vadd.f32 %v95_v13, %v74_v16  ;;  %v52_v20 = vpop.permute.xlu1 %51  ;;  %v3203_v16 = vld [vmem:[%s4962_s1 + $0xb0] sm:$0xff] }
  0x8a   :  { %v47_v21 = vpop.permute.xlu0 %46  ;;  %1113 = vperm.xlu1 %3791, %v3153_v17   ;;  %v76_v26 = vmul.f32 %v4093_v5, %v52_v20  ;;  %v3210_v20 = vld [vmem:[%s4961_s4 + $0x200] sm:$0xff] }
  0x8b   :  { %1108 = vperm.xlu0 %3790, %v3152_v18   ;;  %v130_v23 = vmax.f32 %v123_v19, 0.0  ;;  %v75_v27 = vmul.f32 %v4093_v5, %v47_v21  ;;  %v3204_v19 = vld [vmem:[%s4962_s1 + $0xb8] sm:$0xff]  ;;  %v3211_v21 = vld [vmem:[%s4961_s4 + $0x208] sm:$0xff] }
  0x8d   :  { %v143_v28 = vpack.c.bf16 %v130_v23, %v129_v22  ;;  %v105_v29 = vpop.permute.xlu1 %104  ;;  %v3205_v22 = vld [vmem:[%s4962_s1 + $0xc0] sm:$0xff] }
  0x8e   :  { %v100_v30 = vpop.permute.xlu0 %99  ;;  %v125_v31 = vadd.f32 %v105_v29, %v76_v26  ;;  %1118 = vperm.xlu1 %3791, %v3154_v24   ;;  %v3212_v26 = vld [vmem:[%s4961_s4 + $0x210] sm:$0xff]  ;;  %v3213_v29 = vld [vmem:[%s4961_s4 + $0x218] sm:$0xff] }
  0x8f   :  { %v124_v32 = vadd.f32 %v100_v30, %v75_v27  ;;  %1064 = vperm.xlu0 %3790, %v3147_v25   ;;  %3511 = vmatprep.subr.bf16.mxu0 %v143_v28  ;;  %v3206_v25 = vld [vmem:[%s4962_s1 + $0xc8] sm:$0xff]  ;;  %v3207_v30 = vld [vmem:[%s4962_s1 + $0xd0] sm:$0xff] }
  0x90   :  { %v132_v35 = vmax.f32 %v125_v31, 0.0  ;;  %3512 = vmatpush3.bf16.msra.mxu0 %v143_v28  ;;  %v3208_v31 = vld [vmem:[%s4962_s1 + $0xd8] sm:$0x3] }
  0x91   :  { %v131_v36 = vmax.f32 %v124_v32, 0.0  ;;  %v62_v37 = vpop.permute.xlu1 %61  ;;  %v3214_v32 = vld [vmem:[%s4961_s4 + $0x220] sm:$0xff] }
  0x92   :  { %v57_v38 = vpop.permute.xlu0 %56  ;;  %1162 = vperm.xlu1 %3791, %v3163_v33   ;;  %v78_v42 = vmul.f32 %v4093_v5, %v62_v37 }
  0x93   :  { %1157 = vperm.xlu0 %3790, %v3162_v34   ;;  %v144_v39 = vpack.c.bf16 %v132_v35, %v131_v36  ;;  %v77_v43 = vmul.f32 %v4093_v5, %v57_v38  ;;  %v3223_v35 = vld [vmem:[%s4961_s4 + $0x230] sm:$0xff]  ;;  %v3215_v36 = vld [vmem:[%s4961_s4 + $0x228] sm:$0x3] }
  0x95   :  { %3513 = vmatprep.subr.bf16.mxu0 %v144_v39  ;;  %v115_v44 = vpop.permute.xlu1 %114 }
  0x96   :  { %v110_v45 = vpop.permute.xlu0 %109  ;;  %3514 = vmatpush3.bf16.msra.mxu0 %v144_v39  ;;  %v127_v46 = vadd.f32 %v115_v44, %v78_v42  ;;  %1172 = vperm.xlu1 %3791, %v3165_v40   ;;  %v3225_v39 = vld [vmem:[%s4961_s4 + $0x240] sm:$0xff]  ;;  %v3224_v40 = vld [vmem:[%s4961_s4 + $0x238] sm:$0xff]  ;;  %v3226_v42 = vld [vmem:[%s4961_s4 + $0x248] sm:$0xff] }
  0x97   :  { %v126_v47 = vadd.f32 %v110_v45, %v77_v43  ;;  %1167 = vperm.xlu0 %3790, %v3164_v41   ;;  %v3227_v41 = vld [vmem:[%s4961_s4 + $0x250] sm:$0xff]  ;;  %v3229_v45 = vld [vmem:[%s4961_s4 + $0x260] sm:$0x3] }
  0x98   :  { %v134_v50 = vmax.f32 %v127_v46, 0.0  ;;  %v3228_v46 = vld [vmem:[%s4961_s4 + $0x258] sm:$0xff] }
  0x99   :  { %v133_v51 = vmax.f32 %v126_v47, 0.0  ;;  %v120_v55 = vpop.permute.xlu1 %119 }
  0x9a   :  { %v67_v52 = vpop.permute.xlu0 %66  ;;  %1182 = vperm.xlu1 %3791, %v3167_v48  }
  0x9b   :  { %v79_v53 = vmul.f32 %v4093_v5, %v67_v52  ;;  %1177 = vperm.xlu0 %3790, %v3166_v49   ;;  %v145_v54 = vpack.c.bf16 %v134_v50, %v133_v51  ;;  %v3264_v49 = vld [vmem:[%s4962_s1 + $0xe8] sm:$0xff]  ;;  %v3263_v50 = vld [vmem:[%s4962_s1 + $0xe0] sm:$0xff] }
  0x9c   :  { %v3271_v51 = vld [vmem:[%s4961_s4 + $0x2a8] sm:$0xff]  ;;  %v3270_v52 = vld [vmem:[%s4961_s4 + $0x2a0] sm:$0xff] }
  0x9d   :  { %v128_v58 = vadd.f32 %v120_v55, %v79_v53  ;;  %3515 = vmatprep.subr.bf16.mxu0 %v145_v54  ;;  %v4170_v6 = vpop.permute.xlu1 %162  ;;  %v3266_v55 = vld [vmem:[%s4962_s1 + $0xf8] sm:$0xff] }
  0x9e   :  { %3516 = vmatpush3.bf16.msra.mxu0 %v145_v54  ;;  %1316 = vperm.xlu1 %3791, %v3184_v56   ;;  %v4172_v7 = vpop.permute.xlu0 %157  ;;  %v3265_v56 = vld [vmem:[%s4962_s1 + $0xf0] sm:$0xff] }
  0x9f   :  { %v135_v59 = vmax.f32 %v128_v58, 0.0  ;;  %1187 = vperm.xlu0 %3790, %v3168_v57  }
  0xa1   :  { %v146_v62 = vpack.c.bf16 %v135_v59, %v135_v59  ;;  %v4191_v13 = vpop.permute.xlu1 %172  ;;  %v3273_v59 = vld [vmem:[%s4961_s4 + $0x2b8] sm:$0xff] }
  0xa2   :  { %1326 = vperm.xlu1 %3791, %v3186_v60   ;;  %v4193_v14 = vpop.permute.xlu0 %167  ;;  %v3272_v60 = vld [vmem:[%s4961_s4 + $0x2b0] sm:$0xff] }
  0xa3   :  { %1321 = vperm.xlu0 %3790, %v3185_v61   ;;  %v223_v63 = vsel %vm221_vm1, %v146_v62, 0  ;;  %3775 = vmatprep.subr.msk.bf16.mxu0 %vm221_vm1, %v146_v62  ;;  %v3268_v61 = vld [vmem:[%s4962_s1 + $0x108] sm:$0xff]  ;;  %v3267_v62 = vld [vmem:[%s4962_s1 + $0x100] sm:$0xff] }
  0xa4   :  { %3518 = vmatpush3.bf16.msra.mxu0 %v223_v63 }
  0xa5   :  { %v4202_v17 = vpop.permute.xlu1 %182 }
  0xa6   :  { %1336 = vperm.xlu1 %3791, %v3188_v0   ;;  %v4204_v18 = vpop.permute.xlu0 %177 }
  0xa7   :  { %1331 = vperm.xlu0 %3790, %v3187_v1   ;;  %3520 = vmatmul.mubr.msk.bf16.vlgmr.msra.gmra.mrb[0].mxu0 %vm208_vm0, %v3793_v3  ;;  %v3275_v1 = vld [vmem:[%s4961_s4 + $0x2c8] sm:$0xff]  ;;  %v3274_v3 = vld [vmem:[%s4961_s4 + $0x2c0] sm:$0xff] }
  0xa8   :  { %3523 = vmatprep.mubr.msk.bf16.mxu0 %vm208_vm0, %v3794_v4 }
  0xa9   :  { %v4218_v23 = vpop.permute.xlu1 %536 }
  0xaa   :  { %1346 = vperm.xlu1 %3791, %v3190_v8   ;;  %v4220_v24 = vpop.permute.xlu0 %187 }
  0xab   :  { %1341 = vperm.xlu0 %3790, %v3189_v9   ;;  %v3276_v9 = vld [vmem:[%s4961_s4 + $0x2d0] sm:$0x3] }
  0xad   :  { %v4228_v27 = vpop.permute.xlu1 %586 }
  0xae   :  { %1536 = vperm.xlu1 %3791, %v3202_v10   ;;  %v4230_v28 = vpop.permute.xlu0 %541  ;;  %v3269_v10 = vld [vmem:[%s4962_s1 + $0x110] sm:$0x3] }
  0xaf   :  { %1463 = vperm.xlu0 %3790, %v3200_v11   ;;  %3524 = vmatmul.mubr.msk.bf16.gmra.mrb[4].mxu0 %vm208_vm0, %v3795_v12  ;;  %v3246_v11 = vld [vmem:[%s4961_s4 + $0x270] sm:$0xff]  ;;  %v3245_v12 = vld [vmem:[%s4961_s4 + $0x268] sm:$0xff] }
  0xb1   :  { %v4244_v33 = vpop.permute.xlu1 %546 }
  0xb2   :  { %1590 = vperm.xlu1 %3791, %v3209_v15   ;;  %v4246_v34 = vpop.permute.xlu0 %591 }
  0xb3   :  { %1541 = vperm.xlu0 %3790, %v3203_v16  }
  0xb5   :  { %v4254_v37 = vpop.permute.xlu1 %596 }
  0xb6   :  { %1546 = vperm.xlu1 %3791, %v3204_v19   ;;  %v4256_v38 = vpop.permute.xlu0 %551  ;;  %v3248_v19 = vld [vmem:[%s4961_s4 + $0x280] sm:$0xff] }
  0xb7   :  { %1595 = vperm.xlu0 %3790, %v3210_v20   ;;  %v3247_v20 = vld [vmem:[%s4961_s4 + $0x278] sm:$0xff] }
  0xb9   :  { %v4270_v43 = vpop.permute.xlu1 %556 }
  0xba   :  { %1600 = vperm.xlu1 %3791, %v3211_v21   ;;  %v4272_v44 = vpop.permute.xlu0 %601 }
  0xbb   :  { %1551 = vperm.xlu0 %3790, %v3205_v22  }
  0xbd   :  { %v4280_v47 = vpop.permute.xlu1 %606 }
  0xbe   :  { %1556 = vperm.xlu1 %3791, %v3206_v25   ;;  %v4282_v48 = vpop.permute.xlu0 %561  ;;  %v3250_v25 = vld [vmem:[%s4961_s4 + $0x290] sm:$0xff] }
  0xbf   :  { %1605 = vperm.xlu0 %3790, %v3212_v26   ;;  %v3249_v26 = vld [vmem:[%s4961_s4 + $0x288] sm:$0xff] }
  0xc1   :  { %v4296_v53 = vpop.permute.xlu1 %566 }
  0xc2   :  { %1610 = vperm.xlu1 %3791, %v3213_v29   ;;  %v4298_v54 = vpop.permute.xlu0 %611  ;;  %v3284_v29 = vld [vmem:[%s4961_s4 + $0x2d8] sm:$0xff] }
  0xc3   :  { %1561 = vperm.xlu0 %3790, %v3207_v30   ;;  %v3251_v30 = vld [vmem:[%s4961_s4 + $0x298] sm:$0x3] }
  0xc5   :  { %v4306_v57 = vpop.permute.xlu1 %318 }
  0xc6   :  { %1566 = vperm.xlu1 %3791, %v3208_v31   ;;  %v4308_v58 = vpop.permute.xlu0 %616 }
  0xc7   :  { %1615 = vperm.xlu0 %3790, %v3214_v32  }
  0xc9   :  { %v4322_v63 = vpop.permute.xlu1 %328 }
  0xca   :  { %1659 = vperm.xlu1 %3791, %v3223_v35   ;;  %v4324_v0 = vpop.permute.xlu0 %323  ;;  %v3286_v35 = vld [vmem:[%s4961_s4 + $0x2e8] sm:$0xff] }
  0xcb   :  { %1620 = vperm.xlu0 %3790, %v3215_v36   ;;  %v3285_v36 = vld [vmem:[%s4961_s4 + $0x2e0] sm:$0xff] }
  0xcd   :  { %v4332_v4 = vpop.permute.xlu1 %338 }
  0xce   :  { %1669 = vperm.xlu1 %3791, %v3225_v39   ;;  %v4334_v8 = vpop.permute.xlu0 %333 }
  0xcf   :  { %1664 = vperm.xlu0 %3790, %v3224_v40  }
  0xd1   :  { %v4348_v15 = vpop.permute.xlu1 %348 }
  0xd2   :  { %1679 = vperm.xlu1 %3791, %v3227_v41   ;;  %v4350_v16 = vpop.permute.xlu0 %343  ;;  %v3288_v41 = vld [vmem:[%s4961_s4 + $0x2f8] sm:$0xff] }
  0xd3   :  { %1674 = vperm.xlu0 %3790, %v3226_v42   ;;  %v3287_v42 = vld [vmem:[%s4961_s4 + $0x2f0] sm:$0xff] }
  0xd5   :  { %v4358_v21 = vpop.permute.xlu1 %660 }
  0xd6   :  { %1689 = vperm.xlu1 %3791, %v3229_v45   ;;  %v4360_v22 = vpop.permute.xlu0 %655  ;;  %v3290_v45 = vld [vmem:[%s4961_s4 + $0x308] sm:$0x3] }
  0xd7   :  { %1684 = vperm.xlu0 %3790, %v3228_v46   ;;  %v3289_v46 = vld [vmem:[%s4961_s4 + $0x300] sm:$0xff] }
  0xd9   :  { %v4374_v31 = vpop.permute.xlu1 %670 }
  0xda   :  { %2043 = vperm.xlu1 %3791, %v3264_v49   ;;  %v4376_v32 = vpop.permute.xlu0 %665 }
  0xdb   :  { %2038 = vperm.xlu0 %3790, %v3263_v50  }
  0xdd   :  { %v4384_v39 = vpop.permute.xlu1 %680 }
  0xde   :  { %2093 = vperm.xlu1 %3791, %v3271_v51   ;;  %v4386_v40 = vpop.permute.xlu0 %675  ;;  %v3307_v51 = vld [vmem:[%s4961_s4 + $0x318] sm:$0xff] }
  0xdf   :  { %2088 = vperm.xlu0 %3790, %v3270_v52   ;;  %v3306_v52 = vld [vmem:[%s4961_s4 + $0x310] sm:$0xff] }
  0xe1   :  { %v4400_v49 = vpop.permute.xlu1 %814 }
  0xe2   :  { %2053 = vperm.xlu1 %3791, %v3266_v55   ;;  %v4402_v50 = vpop.permute.xlu0 %685  ;;  %v3796_v55 = vld [vmem:[%s4963_s2 + $0x1c] sm:$0xff]  }
  0xe3   :  { %2048 = vperm.xlu0 %3790, %v3265_v56   ;;  %3535 = vmatprep.mubr.msk.bf16.mxu1 %vm208_vm0, %v3796_v55  ;;  %v3334_v55 = vld [vmem:[%s4961_s4 + $0x360] sm:$0xff] }
  0xe5   :  { %v4413_v56 = vpop.permute.xlu1 %824 }
  0xe6   :  { %2103 = vperm.xlu1 %3791, %v3273_v59   ;;  %v4415_v59 = vpop.permute.xlu0 %819 }
  0xe7   :  { %2098 = vperm.xlu0 %3790, %v3272_v60   ;;  %v3309_v60 = vld [vmem:[%s4961_s4 + $0x328] sm:$0xff] }
  0xea   :  { %2063 = vperm.xlu1 %3791, %v3268_v61   ;;  %v3308_v61 = vld [vmem:[%s4961_s4 + $0x320] sm:$0xff] }
  0xeb   :  { %2058 = vperm.xlu0 %3790, %v3267_v62   ;;  %v3311_v62 = vld [vmem:[%s4961_s4 + $0x338] sm:$0xff] }
  0xee   :  { %2113 = vperm.xlu1 %3791, %v3275_v1   ;;  %v3310_v1 = vld [vmem:[%s4961_s4 + $0x330] sm:$0xff] }
  0xef   :  { %2108 = vperm.xlu0 %3790, %v3274_v3   ;;  %v4430_v3 = vpop.permute.xlu1 %834 }
  0xf2   :  { %2118 = vperm.xlu1 %3791, %v3276_v9   ;;  %v4432_v9 = vpop.permute.xlu0 %829 }
  0xf3   :  { %2068 = vperm.xlu0 %3790, %v3269_v10   ;;  %v3261_v10 = vld [vmem:[%s4964_s5 + $0xc] sm:$0xf] }
  0xf6   :  { %1823 = vperm.xlu1 %3791, %v3246_v11   ;;  %v3312_v11 = vld [vmem:[%s4961_s4 + $0x340] sm:$0x3] }
  0xf7   :  { %1818 = vperm.xlu0 %3790, %v3245_v12   ;;  %v4440_v12 = vpop.permute.xlu1 %844 }
  0xfa   :  { %1833 = vperm.xlu1 %3791, %v3248_v19   ;;  %v4442_v19 = vpop.permute.xlu0 %839 }
  0xfb   :  { %1828 = vperm.xlu0 %3790, %v3247_v20   ;;  %v3324_v20 = vld [vmem:[%s4962_s1 + $0x118] sm:$0xff] }
  0xfe   :  { %1843 = vperm.xlu1 %3791, %v3250_v25   ;;  %v3322_v25 = vld [vmem:[%s4964_s5 + $0x10] sm:$0xf] }
  0xff   :  { %1838 = vperm.xlu0 %3790, %v3249_v26   ;;  %v3331_v26 = vld [vmem:[%s4961_s4 + $0x348] sm:$0xff] }
 0x102   :  { %2157 = vperm.xlu1 %3791, %v3284_v29   ;;  %v3325_v29 = vld [vmem:[%s4962_s1 + $0x120] sm:$0xff] }
 0x103   :  { %1848 = vperm.xlu0 %3790, %v3251_v30   ;;  %v4456_v30 = vpop.permute.xlu1 %961 }
 0x106   :  { %2167 = vperm.xlu1 %3791, %v3286_v35   ;;  %v4458_v35 = vpop.permute.xlu0 %463 }
 0x107   :  { %2162 = vperm.xlu0 %3790, %v3285_v36   ;;  %v3326_v36 = vld [vmem:[%s4962_s1 + $0x128] sm:$0xff] }
 0x10a   :  { %2177 = vperm.xlu1 %3791, %v3288_v41   ;;  %v3332_v41 = vld [vmem:[%s4961_s4 + $0x350] sm:$0xff] }
 0x10b   :  { %2172 = vperm.xlu0 %3790, %v3287_v42   ;;  %v4466_v42 = vpop.permute.xlu1 %1039 }
 0x10c   :  { %4968 = vst [vmem:[#allocation2_spill] sm:$0xff] %v4466_v42 }
 0x10e   :  { %2187 = vperm.xlu1 %3791, %v3290_v45   ;;  %v4468_v45 = vpop.permute.xlu0 %1034 }
 0x10f   :  { %2182 = vperm.xlu0 %3790, %v3289_v46   ;;  %v3333_v46 = vld [vmem:[%s4961_s4 + $0x358] sm:$0xff] }
 0x112   :  { %2321 = vperm.xlu1 %3791, %v3307_v51   ;;  %v3327_v51 = vld [vmem:[%s4962_s1 + $0x130] sm:$0xff] }
 0x113   :  { %2316 = vperm.xlu0 %3790, %v3306_v52   ;;  %v3328_v52 = vld [vmem:[%s4962_s1 + $0x138] sm:$0xff] }
 0x116   :  { %2331 = vperm.xlu1 %3791, %v3309_v60   ;;  %v4482_v60 = vpop.permute.xlu1 %1093 }
 0x117   :  { %2326 = vperm.xlu0 %3790, %v3308_v61   ;;  %4969 = vst [vmem:[#allocation3_spill] sm:$0xff] %v4482_v60  ;;  %v4484_v61 = vpop.permute.xlu0 %1088 }
 0x118   :  { %4970 = vst [vmem:[#allocation4_spill] sm:$0xff] %v4484_v61 }
 0x11a   :  { %2341 = vperm.xlu1 %3791, %v3311_v62   ;;  %v3335_v62 = vld [vmem:[%s4961_s4 + $0x368] sm:$0xff] }
 0x11b   :  { %2336 = vperm.xlu0 %3790, %v3310_v1   ;;  %v3329_v1 = vld [vmem:[%s4962_s1 + $0x140] sm:$0xff] }
 0x11e   :  { %1965 = vperm.xlu1 %3791, %v3261_v10   ;;  %v4492_v10 = vpop.permute.xlu1 %1049 }
 0x11f   :  { %2346 = vperm.xlu0 %3790, %v3312_v11   ;;  %4971 = vst [vmem:[#allocation5_spill] sm:$0xff] %v4492_v10  ;;  %v4494_v11 = vpop.permute.xlu0 %1044 }
 0x120   :  { %4972 = vst [vmem:[#allocation6_spill] sm:$0xff] %v4494_v11 }
 0x122   :  { %2536 = vperm.xlu1 %3791, %v3324_v20   ;;  %v3330_v20 = vld [vmem:[%s4962_s1 + $0x148] sm:$0x3] }
 0x123   :  { %2463 = vperm.xlu0 %3790, %v3322_v25   ;;  %v3336_v25 = vld [vmem:[%s4961_s4 + $0x370] sm:$0xff] }
 0x126   :  { %2590 = vperm.xlu1 %3791, %v3331_v26   ;;  %v3345_v26 = vld [vmem:[%s4961_s4 + $0x380] sm:$0xff] }
 0x127   :  { %2541 = vperm.xlu0 %3790, %v3325_v29   ;;  %v3337_v29 = vld [vmem:[%s4961_s4 + $0x378] sm:$0x3] }
 0x12a   :  { %2546 = vperm.xlu1 %3791, %v3326_v36   ;;  %v4508_v36 = vpop.permute.xlu1 %1103 }
 0x12b   :  { %2595 = vperm.xlu0 %3790, %v3332_v41   ;;  %4973 = vst [vmem:[#allocation7_spill] sm:$0xff] %v4508_v36  ;;  %v4510_v41 = vpop.permute.xlu0 %1098 }
 0x12c   :  { %4974 = vst [vmem:[#allocation8_spill] sm:$0xff] %v4510_v41 }
 0x12e   :  { %2600 = vperm.xlu1 %3791, %v3333_v46   ;;  %v3347_v46 = vld [vmem:[%s4961_s4 + $0x390] sm:$0xff] }
 0x12f   :  { %2551 = vperm.xlu0 %3790, %v3327_v51   ;;  %v3346_v51 = vld [vmem:[%s4961_s4 + $0x388] sm:$0xff] }
 0x132   :  { %2556 = vperm.xlu1 %3791, %v3328_v52   ;;  %v4518_v52 = vpop.permute.xlu1 %1059 }
 0x133   :  { %2605 = vperm.xlu0 %3790, %v3334_v55   ;;  %4975 = vst [vmem:[#allocation9_spill] sm:$0xff] %v4518_v52  ;;  %v4520_v55 = vpop.permute.xlu0 %1054 }
 0x134   :  { %4976 = vst [vmem:[#allocation10_spill] sm:$0xff] %v4520_v55 }
 0x136   :  { %2610 = vperm.xlu1 %3791, %v3335_v62   ;;  %v3349_v62 = vld [vmem:[%s4961_s4 + $0x3a0] sm:$0xff] }
 0x137   :  { %2561 = vperm.xlu0 %3790, %v3329_v1   ;;  %v3348_v1 = vld [vmem:[%s4961_s4 + $0x398] sm:$0xff] }
 0x13a   :  { %2566 = vperm.xlu1 %3791, %v3330_v20   ;;  %v3351_v20 = vld [vmem:[%s4961_s4 + $0x3b0] sm:$0x3] }
 0x13b   :  { %2615 = vperm.xlu0 %3790, %v3336_v25   ;;  %v3350_v25 = vld [vmem:[%s4961_s4 + $0x3a8] sm:$0xff] }
 0x13e   :  { %2659 = vperm.xlu1 %3791, %v3345_v26   ;;  %v4534_v26 = vpop.permute.xlu1 %1113 }
 0x13f   :  { %2620 = vperm.xlu0 %3790, %v3337_v29   ;;  %4977 = vst [vmem:[#allocation11_spill] sm:$0xff] %v4534_v26  ;;  %v4536_v29 = vpop.permute.xlu0 %1108  ;;  %v3370_v26 = vld [vmem:[%s4961_s4 + $0x3d0] sm:$0xff] }
 0x140   :  { %4978 = vst [vmem:[#allocation12_spill] sm:$0xff] %v4536_v29 }
 0x142   :  { %2669 = vperm.xlu1 %3791, %v3347_v46   ;;  %v3368_v46 = vld [vmem:[%s4961_s4 + $0x3c0] sm:$0xff] }
 0x143   :  { %2664 = vperm.xlu0 %3790, %v3346_v51   ;;  %v3367_v51 = vld [vmem:[%s4961_s4 + $0x3b8] sm:$0xff] }
 0x146   :  { %2679 = vperm.xlu1 %3791, %v3349_v62   ;;  %v4544_v62 = vpop.permute.xlu1 %1118 }
 0x147   :  { %2674 = vperm.xlu0 %3790, %v3348_v1   ;;  %4979 = vst [vmem:[#allocation13_spill] sm:$0xff] %v4544_v62  ;;  %v4546_v1 = vpop.permute.xlu0 %1064  ;;  %v3371_v62 = vld [vmem:[%s4961_s4 + $0x3d8] sm:$0xff] }
 0x148   :  { %4980 = vst [vmem:[#allocation14_spill] sm:$0xff] %v4546_v1  ;;  %v3383_v1 = vld [vmem:[%s4964_s5 + $0x14] sm:$0xf] }
 0x14a   :  { %2689 = vperm.xlu1 %3791, %v3351_v20   ;;  %v3369_v20 = vld [vmem:[%s4961_s4 + $0x3c8] sm:$0xff] }
 0x14b   :  { %2684 = vperm.xlu0 %3790, %v3350_v25   ;;  %v3372_v25 = vld [vmem:[%s4961_s4 + $0x3e0] sm:$0xff] }
 0x14e   :  { %2823 = vperm.xlu1 %3791, %v3368_v46   ;;  %v4560_v46 = vpop.permute.xlu1 %1162 }
 0x14f   :  { %2818 = vperm.xlu0 %3790, %v3367_v51   ;;  %4981 = vst [vmem:[#allocation15_spill] sm:$0xff] %v4560_v46  ;;  %v4562_v51 = vpop.permute.xlu0 %1157 }
 0x150   :  { %4982 = vst [vmem:[#allocation16_spill] sm:$0xff] %v4562_v51 }
 0x152   :  { %2833 = vperm.xlu1 %3791, %v3370_v26   ;;  %v3373_v26 = vld [vmem:[%s4961_s4 + $0x3e8] sm:$0x3] }
 0x153   :  { %2828 = vperm.xlu0 %3790, %v3369_v20   ;;  %v4570_v20 = vpop.permute.xlu1 %1172  ;;  %v4572_v29 = vpop.permute.xlu0 %1167 }
 0x154   :  { %4983 = vst [vmem:[#allocation17_spill] sm:$0xff] %v4570_v20  ;;  %4984 = vst [vmem:[#allocation18_spill] sm:$0xff] %v4572_v29 }
 0x156   :  { %2843 = vperm.xlu1 %3791, %v3372_v25  }
 0x157   :  { %2838 = vperm.xlu0 %3790, %v3371_v62  }
 0x15a   :  { %2965 = vperm.xlu1 %3791, %v3383_v1  }
 0x15b   :  { %2848 = vperm.xlu0 %3790, %v3373_v26  }
 0x17a   :  { %v3521_v36 = vpop.f32.mrb[0].mxu0 }
 0x17b   :  { %v268_v46 = vadd.f32 %v3521_v36, %v4193_v14  ;;  %v259_v51 = vpop.f32.mrb[1].mxu0 }
 0x17c   :  { %v260_v62 = vadd.f32 %v259_v51, %v4172_v7  ;;  %v3522_v25 = vpop.f32.mrb[2].mxu0  ;;  %v570_v7 = vmul.f32 %v4093_v5, %v4230_v28  ;;  %v3797_v51 = vld [vmem:[%s4963_s2 + $0x24] sm:$0xff]  }
 0x17d   :  { %v271_v41 = vadd.f32 %v3522_v25, %v4191_v13  ;;  %v262_v60 = vpop.f32.mrb[3].mxu0  ;;  %v291_v52 = vmax.f32 %v268_v46, 0.0 }
 0x17e   :  { %v263_v61 = vadd.f32 %v262_v60, %v4170_v6  ;;  %v289_v10 = vmax.f32 %v260_v62, 0.0  ;;  %v569_v60 = vmul.f32 %v4093_v5, %v4218_v23 }
 0x17f   :  { %v292_v55 = vmax.f32 %v271_v41, 0.0 }
 0x180   :  { %v290_v20 = vmax.f32 %v263_v61, 0.0  ;;  %v620_v61 = vadd.f32 %v4246_v34, %v570_v7  ;;  %v3802_v7 = vld [vmem:[%s4963_s2 + $0x48] sm:$0xff]  }
 0x181   :  { %v305_v11 = vpack.c.bf16 %v292_v55, %v291_v52  ;;  %v572_v52 = vmul.f32 %v4093_v5, %v4256_v38  ;;  %v573_v38 = vmul.f32 %v4093_v5, %v4270_v43  ;;  %v575_v43 = vmul.f32 %v4093_v5, %v4296_v53 }
 0x182   :  { %v3525_v29 = vpop.f32.mrb[4].mxu0  ;;  %v304_v1 = vpack.c.bf16 %v290_v20, %v289_v10  ;;  %v627_v55 = vmax.f32 %v620_v61, 0.0 }
 0x183   :  { %v275_v26 = vpop.f32.mrb[5].mxu0  ;;  %v284_v42 = vadd.f32 %v3525_v29, %v4220_v24  ;;  %v622_v29 = vadd.f32 %v4272_v44, %v572_v52  ;;  %v623_v20 = vadd.f32 %v4280_v47, %v573_v38  ;;  %v3799_v47 = vld [vmem:[%s4963_s2 + $0x34] ss:$0 sps:$4 sm:$0x11]  }
 0x184   :  { %v276_v14 = vadd.f32 %v275_v26, %v4204_v18  ;;  %v3526_v36 = vpop.f32.mrb[6].mxu0  ;;  %3527 = vmatprep.subr.bf16.mxu1 %v304_v1  ;;  %v619_v18 = vadd.f32 %v4228_v27, %v569_v60  ;;  %v574_v27 = vmul.f32 %v4093_v5, %v4282_v48 }
 0x185   :  { %v278_v13 = vpop.f32.mrb[7].mxu0  ;;  %3528 = vmatpush3.bf16.msra.mxu1 %v304_v1  ;;  %v295_v10 = vmax.f32 %v284_v42, 0.0  ;;  %v630_v1 = vmax.f32 %v623_v20, 0.0  ;;  %v3801_v36 = vld [vmem:[%s4963_s2 + $0x40] sm:$0xff]  }
 0x186   :  { %v279_v6 = vadd.f32 %v278_v13, %v4202_v17  ;;  %3529 = vmatprep.subr.bf16.mxu1 %v305_v11  ;;  %v293_v41 = vmax.f32 %v276_v14, 0.0  ;;  %v571_v17 = vmul.f32 %v4093_v5, %v4244_v33  ;;  %v626_v23 = vmax.f32 %v619_v18, 0.0  ;;  %v3800_v5 = vld [vmem:[%s4963_s2 + $0x38] sm:$0xff]   ;;  %v3803_v13 = vld [vmem:[%s4963_s2 + $0x50] ss:$0 sps:$4 sm:$0x11]  }
 0x187   :  { %v307_v46 = vpack.c.bf16 %v295_v10, %v295_v10  ;;  %v624_v33 = vadd.f32 %v4298_v54, %v574_v27  ;;  %v625_v54 = vadd.f32 %v4308_v58, %v575_v43 }
 0x188   :  { %v294_v24 = vmax.f32 %v279_v6, 0.0  ;;  %v621_v34 = vadd.f32 %v4254_v37, %v571_v17  ;;  %v641_v42 = vpack.c.bf16 %v627_v55, %v626_v23  ;;  %v3798_v37 = vld [vmem:[%s4963_s2 + $0x2c] sm:$0xff]   ;;  %v3855_v6 = vmov 0.0  }
 0x189   :  { %3530 = vmatpush3.bf16.msra.mxu1 %v305_v11  ;;  %v629_v11 = vmax.f32 %v622_v29, 0.0  ;;  %v382_v44 = vsel %vm221_vm1, %v307_v46, 0  ;;  %v631_v62 = vmax.f32 %v624_v33, 0.0  ;;  %v632_v26 = vmax.f32 %v625_v54, 0.0  ;;  %3543 = vmatprep.subr.bf16.mxu0 %v3855_v6 }
 0x18a   :  { %v306_v28 = vpack.c.bf16 %v294_v24, %v293_v41  ;;  %v628_v48 = vmax.f32 %v621_v34, 0.0  ;;  %3551 = vmatprep.mubr.msk.bf16.mxu0 %vm3856_vm2, %v3855_v6 }
 0x18b   :  { %v643_v14 = vpack.c.bf16 %v631_v62, %v630_v1  ;;  %v644_v53 = vpack.c.bf16 %v632_v26, %v632_v26 }
 0x18c   :  { %3531 = vmatprep.subr.bf16.mxu1 %v306_v28  ;;  %v642_v25 = vpack.c.bf16 %v629_v11, %v628_v48 }
 0x18d   :  { %3532 = vmatpush3.bf16.msra.mxu1 %v306_v28  ;;  %v719_v58 = vsel %vm221_vm1, %v644_v53, 0 }
 0x18e   :  { %3776 = vmatprep.subr.msk.bf16.mxu1 %vm221_vm1, %v307_v46 }
 0x191   :  { %3534 = vmatpush3.bf16.msra.mxu1 %v382_v44 }
 0x192   :  { %3555 = vmatprep.subr.bf16.mxu1 %v641_v42 }
 0x194   :  { %3536 = vmatmul.mubr.msk.bf16.vlgmr.msra.gmra.mrb[0].mxu1 %vm208_vm0, %v3797_v51 }
 0x195   :  { %3556 = vmatpush3.bf16.msra.mxu1 %v641_v42  ;;  %3539 = vmatprep.mubr.msk.bf16.mxu1 %vm208_vm0, %v3798_v37 }
 0x196   :  { %3557 = vmatprep.subr.bf16.mxu1 %v642_v25 }
 0x199   :  { %3558 = vmatpush3.bf16.msra.mxu1 %v642_v25 }
 0x19a   :  { %3559 = vmatprep.subr.bf16.mxu1 %v643_v14 }
 0x19c   :  { %3540 = vmatmul.mubr.msk.bf16.gmra.mrb[4].mxu1 %vm208_vm0, %v3799_v47 }
 0x19d   :  { %3560 = vmatpush3.bf16.msra.mxu1 %v643_v14  ;;  %3563 = vmatprep.mubr.msk.bf16.mxu1 %vm208_vm0, %v3800_v5 }
 0x19e   :  { %3777 = vmatprep.subr.msk.bf16.mxu1 %vm221_vm1, %v644_v53 }
 0x1a1   :  { %3562 = vmatpush3.bf16.msra.mxu1 %v719_v58 }
 0x1a2   :  { %3587 = vmatprep.subr.bf16.mxu1 %v3855_v6 }
 0x1a4   :  { %3564 = vmatmul.mubr.msk.bf16.vlgmr.msra.gmra.mrb[8].mxu1 %vm208_vm0, %v3801_v36 }
 0x1a5   :  { %3567 = vmatprep.mubr.msk.bf16.mxu1 %vm208_vm0, %v3802_v7 }
 0x1ac   :  { %3568 = vmatmul.mubr.msk.bf16.gmra.mrb[12].mxu1 %vm208_vm0, %v3803_v13 }
 0x1ad   :  { %3595 = vmatprep.mubr.msk.bf16.mxu1 %vm3856_vm2, %v3855_v6 }
 0x267   :  { %v3537_v60 = vpop.f32.mrb[0].mxu1 }
 0x268   :  { %v427_v61 = vadd.f32 %v3537_v60, %v4322_v63  ;;  %v418_v10 = vpop.f32.mrb[1].mxu1 }
 0x269   :  { %v419_v41 = vadd.f32 %v418_v10, %v4306_v57  ;;  %v3538_v24 = vpop.f32.mrb[2].mxu1 }
 0x26a   :  { %v430_v18 = vadd.f32 %v3538_v24, %v4334_v8  ;;  %v421_v52 = vpop.f32.mrb[3].mxu1  ;;  %v450_v55 = vmax.f32 %v427_v61, 0.0 }
 0x26b   :  { %v422_v28 = vadd.f32 %v421_v52, %v4324_v0  ;;  %v448_v29 = vmax.f32 %v419_v41, 0.0  ;;  %v3807_v52 = vld [vmem:[%s4963_s2 + $0x6c] ss:$0 sps:$4 sm:$0x11]  }
 0x26c   :  { %v451_v17 = vmax.f32 %v430_v18, 0.0 }
 0x26d   :  { %v449_v46 = vmax.f32 %v422_v28, 0.0 }
 0x26e   :  { %v457_v23 = vpack.c.bf16 %v451_v17, %v450_v55 }
 0x26f   :  { %v456_v34 = vpack.c.bf16 %v449_v46, %v448_v29  ;;  %v3541_v27 = vpop.f32.mrb[4].mxu1 }
 0x270   :  { %v443_v42 = vadd.f32 %v3541_v27, %v4348_v15  ;;  %v434_v38 = vpop.f32.mrb[5].mxu1  ;;  %v26_v27 = vld [vmem:[%s4965_s0 + $0x2] sm:$0x1] }
 0x271   :  { %v435_v63 = vadd.f32 %v434_v38, %v4332_v4  ;;  %v3542_v11 = vpop.f32.mrb[6].mxu1  ;;  %3544 = vmatpush3.bf16.msra.mxu0 %v456_v34 }
 0x272   :  { %v437_v57 = vpop.f32.mrb[7].mxu1  ;;  %3545 = vmatprep.subr.bf16.mxu0 %v3855_v6  ;;  %v454_v0 = vmax.f32 %v443_v42, 0.0 }
 0x273   :  { %v438_v8 = vadd.f32 %v437_v57, %v4350_v16  ;;  %v452_v33 = vmax.f32 %v435_v63, 0.0 }
 0x274   :  { %v459_v48 = vpack.c.bf16 %v454_v0, %v454_v0 }
 0x275   :  { %v453_v44 = vmax.f32 %v438_v8, 0.0  ;;  %3546 = vmatpush3.bf16.msra.mxu0 %v457_v23 }
 0x276   :  { %3547 = vmatprep.subr.bf16.mxu0 %v3855_v6  ;;  %v470_v26 = vsel %vm221_vm1, %v459_v48, 0 }
 0x277   :  { %v458_v51 = vpack.c.bf16 %v453_v44, %v452_v33  ;;  %v3565_v37 = vpop.f32.mrb[8].mxu1 }
 0x278   :  { %v764_v15 = vadd.f32 %v3565_v37, %v4376_v32  ;;  %v755_v20 = vpop.f32.mrb[9].mxu1 }
 0x279   :  { %v756_v4 = vadd.f32 %v755_v20, %v4360_v22  ;;  %3548 = vmatpush3.bf16.msra.mxu0 %v458_v51  ;;  %v3566_v43 = vpop.f32.mrb[10].mxu1  ;;  %v455_v22 = vld [vmem:[%s4966_s3] sm:$0x3] }
 0x27a   :  { %v767_v62 = vadd.f32 %v3566_v43, %v4374_v31  ;;  %v758_v54 = vpop.f32.mrb[11].mxu1  ;;  %3549 = vmatprep.subr.bf16.mxu0 %v3855_v6  ;;  %v787_v25 = vmax.f32 %v764_v15, 0.0  ;;  %v3804_v31 = vld [vmem:[%s4963_s2 + $0x54] sm:$0xff]  }
 0x27b   :  { %v759_v16 = vadd.f32 %v758_v54, %v4358_v21  ;;  %v785_v14 = vmax.f32 %v756_v4, 0.0 }
 0x27c   :  { %v788_v1 = vmax.f32 %v767_v62, 0.0 }
 0x27d   :  { %v786_v47 = vmax.f32 %v759_v16, 0.0  ;;  %3550 = vmatpush3.bf16.msra.mxu0 %v470_v26 }
 0x27e   :  { %v801_v32 = vpack.c.bf16 %v788_v1, %v787_v25 }
 0x27f   :  { %v800_v5 = vpack.c.bf16 %v786_v47, %v785_v14  ;;  %v3569_v53 = vpop.f32.mrb[12].mxu1 }
 0x280   :  { %3552 = vmatmul.mubr.msk.bf16.vlgmr.msra.gmra.mrb[8].mxu0 %vm208_vm0, %v455_v22  ;;  %v771_v21 = vpop.f32.mrb[13].mxu1  ;;  %v780_v58 = vadd.f32 %v3569_v53, %v4402_v50  ;;  %v3805_v50 = vld [vmem:[%s4963_s2 + $0x5c] sm:$0xff]  }
 0x281   :  { %v772_v36 = vadd.f32 %v771_v21, %v4386_v40  ;;  %v3570_v7 = vpop.f32.mrb[14].mxu1  ;;  %3571 = vmatprep.subr.bf16.mxu0 %v800_v5  ;;  %3579 = vmatprep.mubr.msk.bf16.mxu0 %vm208_vm0, %v3804_v31 }
 0x282   :  { %v774_v13 = vpop.f32.mrb[15].mxu1  ;;  %3572 = vmatpush3.bf16.msra.mxu0 %v800_v5  ;;  %v791_v61 = vmax.f32 %v780_v58, 0.0  ;;  %v25_v7 = vld [vmem:[%s4965_s0 + $0x1] sm:$0x1] }
 0x283   :  { %v775_v60 = vadd.f32 %v774_v13, %v4384_v39  ;;  %3573 = vmatprep.subr.bf16.mxu0 %v801_v32  ;;  %v789_v10 = vmax.f32 %v772_v36, 0.0  ;;  %v3806_v39 = vld [vmem:[%s4963_s2 + $0x64] sm:$0xff]  }
 0x284   :  { %v803_v18 = vpack.c.bf16 %v791_v61, %v791_v61 }
 0x285   :  { %v790_v41 = vmax.f32 %v775_v60, 0.0 }
 0x286   :  { %3574 = vmatpush3.bf16.msra.mxu0 %v801_v32  ;;  %v878_v40 = vsel %vm221_vm1, %v803_v18, 0 }
 0x287   :  { %v802_v24 = vpack.c.bf16 %v790_v41, %v789_v10 }
 0x289   :  { %3575 = vmatprep.subr.bf16.mxu0 %v802_v24 }
 0x28a   :  { %3576 = vmatpush3.bf16.msra.mxu0 %v802_v24 }
 0x28b   :  { %3778 = vmatprep.subr.msk.bf16.mxu0 %vm221_vm1, %v803_v18 }
 0x28e   :  { %3578 = vmatpush3.bf16.msra.mxu0 %v878_v40 }
 0x291   :  { %3580 = vmatmul.mubr.msk.bf16.vlgmr.msra.gmra.mrb[12].mxu0 %vm208_vm0, %v3805_v50 }
 0x292   :  { %3583 = vmatprep.mubr.msk.bf16.mxu0 %vm208_vm0, %v3806_v39 }
 0x299   :  { %3584 = vmatmul.mubr.msk.bf16.gmra.mrb[16].mxu0 %vm208_vm0, %v3807_v52 }
 0x353   :  { %v506_v28 = vpop.f32.mrb[8].mxu0 }
 0x354   :  { %v507_v55 = vadd.f32 %v506_v28, %v4458_v35  ;;  %v3553_v17 = vpop.f32.mrb[9].mxu0  ;;  %v4985_v28 = vld [vmem:[#allocation2_spill] sm:$0xff] }
 0x355   :  { %v509_v29 = vpop.f32.mrb[10].mxu0 }
 0x356   :  { %v512_v46 = vmul.f32 1.442695, %v507_v55  ;;  %v3554_v23 = vpop.f32.mrb[11].mxu0  ;;  %v523_v11 = vrot.slane %v507_v55, 1  ;;  %v4986_v29 = vld [vmem:[#allocation6_spill] sm:$0xff] }
 0x357   :  { %v4987_v23 = vld [vmem:[#allocation5_spill] sm:$0xff] }
 0x358   :  { %3840 = vpow2.f32 %v512_v46 }
 0x362   :  { %v3841_v34 = vpop.eup %3840 }
 0x363   :  { %v519_v42 = vrot.slane %v3841_v34, 3  ;;  %v515_v36 = vrot.slane %v3841_v34, 2  ;;  %v4988_v34 = vld [vmem:[#allocation10_spill] sm:$0xff] }
 0x364   :  { %v3581_v38 = vpop.f32.mrb[12].mxu0 }
 0x365   :  { %v521_v63 = vmul.f32 %v519_v42, %v26_v27  ;;  %v923_v57 = vadd.f32 %v3581_v38, %v4413_v56  ;;  %v914_v8 = vpop.f32.mrb[13].mxu0  ;;  %v517_v13 = vmul.f32 %v515_v36, %v25_v7  ;;  %v4989_v42 = vld [vmem:[#allocation9_spill] sm:$0xff]  ;;  %v1178_v7 = vpop.permute.xlu0 %1177 }
 0x366   :  { %v915_v0 = vadd.f32 %v914_v8, %v4400_v49  ;;  %v3582_v35 = vpop.f32.mrb[14].mxu0 }
 0x367   :  { %v525_v33 = vadd.f32 %v523_v11, %v521_v63  ;;  %v926_v44 = vadd.f32 %v3582_v35, %v4432_v9  ;;  %v917_v51 = vpop.f32.mrb[15].mxu0  ;;  %v946_v48 = vmax.f32 %v923_v57, 0.0  ;;  %v518_v61 = vadd.f32 %v517_v13, %v507_v55  ;;  %v4990_v63 = vld [vmem:[#allocation4_spill] sm:$0xff]  ;;  %v4991_v57 = vld [vmem:[#allocation3_spill] sm:$0xff]  ;;  %v5000_v13 = vld [vmem:[#allocation17_spill] sm:$0xff] }
 0x368   :  { %v918_v37 = vadd.f32 %v917_v51, %v4415_v59  ;;  %v944_v20 = vmax.f32 %v915_v0, 0.0  ;;  %v4992_v0 = vld [vmem:[#allocation8_spill] sm:$0xff] }
 0x369   :  { %v947_v15 = vmax.f32 %v926_v44, 0.0  ;;  %v4994_v51 = vld [vmem:[#allocation12_spill] sm:$0xff] }
 0x36a   :  { %v945_v4 = vmax.f32 %v918_v37, 0.0  ;;  %v4995_v37 = vld [vmem:[#allocation11_spill] sm:$0xff] }
 0x36b   :  { %v954_v43 = vpack.c.bf16 %v947_v15, %v946_v48  ;;  %v4996_v15 = vld [vmem:[#allocation14_spill] sm:$0xff] }
 0x36c   :  { %v953_v62 = vpack.c.bf16 %v945_v4, %v944_v20  ;;  %v3585_v54 = vpop.f32.mrb[16].mxu0 }
 0x36d   :  { %v939_v16 = vadd.f32 %v3585_v54, %v4440_v12  ;;  %v930_v56 = vpop.f32.mrb[17].mxu0  ;;  %v3138_v12 = vld [vmem:[%s4966_s3 + $0x2] sm:$0x3] }
 0x36e   :  { %v931_v25 = vadd.f32 %v930_v56, %v4430_v3  ;;  %v3586_v49 = vpop.f32.mrb[18].mxu0  ;;  %3588 = vmatpush3.bf16.msra.mxu1 %v953_v62 }
 0x36f   :  { %v933_v1 = vpop.f32.mrb[19].mxu0  ;;  %3589 = vmatprep.subr.bf16.mxu1 %v3855_v6  ;;  %v950_v59 = vmax.f32 %v939_v16, 0.0 }
 0x370   :  { %v934_v9 = vadd.f32 %v933_v1, %v4442_v19  ;;  %v948_v26 = vmax.f32 %v931_v25, 0.0  ;;  %v3808_v19 = vld [vmem:[%s4963_s2 + $0x70] sm:$0xff]   ;;  %v4997_v1 = vld [vmem:[#allocation13_spill] sm:$0xff] }
 0x371   :  { %v956_v22 = vpack.c.bf16 %v950_v59, %v950_v59  ;;  %3607 = vmatprep.mubr.msk.bf16.mxu0 %vm208_vm0, %v3808_v19  ;;  %v3812_v19 = vld [vmem:[%s4963_s2 + $0x8c] sm:$0xff]  }
 0x372   :  { %v949_v14 = vmax.f32 %v934_v9, 0.0  ;;  %3590 = vmatpush3.bf16.msra.mxu1 %v954_v43 }
 0x373   :  { %3591 = vmatprep.subr.bf16.mxu1 %v3855_v6  ;;  %v968_v3 = vsel %vm221_vm1, %v956_v22, 0  ;;  %v3809_v22 = vld [vmem:[%s4963_s2 + $0x78] sm:$0xff]  }
 0x374   :  { %v955_v47 = vpack.c.bf16 %v949_v14, %v948_v26 }
 0x376   :  { %3592 = vmatpush3.bf16.msra.mxu1 %v955_v47 }
 0x377   :  { %3593 = vmatprep.subr.bf16.mxu1 %v3855_v6 }
 0x37a   :  { %3594 = vmatpush3.bf16.msra.mxu1 %v968_v3  ;;  %v3810_v3 = vld [vmem:[%s4963_s2 + $0x80] sm:$0xff]  }
 0x37d   :  { %3596 = vmatmul.mubr.msk.bf16.vlgmr.msra.gmra.mrb[16].mxu1 %vm208_vm0, %v3138_v12  ;;  %v3811_v12 = vld [vmem:[%s4963_s2 + $0x88] ss:$0 sps:$4 sm:$0x11]  }
 0x37e   :  { %3623 = vmatprep.mubr.msk.bf16.mxu1 %vm208_vm0, %v3812_v19 }
 0x450   :  { %v1004_v31 = vpop.f32.mrb[16].mxu1 }
 0x451   :  { %v1005_v32 = vadd.f32 %v1004_v31, %v4456_v30  ;;  %v3597_v5 = vpop.f32.mrb[17].mxu1 }
 0x452   :  { %v1007_v53 = vpop.f32.mrb[18].mxu1 }
 0x453   :  { %v1010_v21 = vmul.f32 1.442695, %v1005_v32  ;;  %v3598_v58 = vpop.f32.mrb[19].mxu1  ;;  %v1021_v40 = vrot.slane %v1005_v32, 1 }
 0x455   :  { %3842 = vpow2.f32 %v1010_v21  ;;  %v4999_v21 = vld [vmem:[#allocation16_spill] sm:$0xff] }
 0x45f   :  { %v3843_v60 = vpop.eup %3842 }
 0x460   :  { %v1013_v10 = vrot.slane %v3843_v60, 2  ;;  %v1017_v41 = vrot.slane %v3843_v60, 3 }
 0x462   :  { %v1015_v24 = vmul.f32 %v1013_v10, %v518_v61  ;;  %v1019_v18 = vmul.f32 %v1017_v41, %v525_v33  ;;  %v4993_v33 = vld [vmem:[#allocation7_spill] sm:$0xff] }
 0x463   :  { %v5001_v10 = vld [vmem:[#allocation15_spill] sm:$0xff] }
 0x464   :  { %v4707_v50 = vadd.f32 %v1015_v24, %v1005_v32  ;;  %v4709_v30 = vadd.f32 %v1021_v40, %v1019_v18  ;;  %v4998_v32 = vld [vmem:[#allocation18_spill] sm:$0xff] }
 0x466   :  { %v1070_v39 = vrot.slane %v4707_v50, %v4082_v2 }
 0x468   :  { %v1071_v52 = vmul.f32 %v1070_v39, %v4468_v45  ;;  %v1072_v17 = vmul.f32 %v1070_v39, %v4985_v28  ;;  %v1073_v46 = vmul.f32 %v1070_v39, %v4986_v29  ;;  %v1074_v55 = vmul.f32 %v1070_v39, %v4987_v23  ;;  %v1188_v29 = vpop.permute.xlu0 %1187 }
 0x469   :  { %v1075_v27 = vmul.f32 %v1070_v39, %v4988_v34  ;;  %v1076_v38 = vmul.f32 %v1070_v39, %v4989_v42  ;;  %v1077_v20 = vmul.f32 %v1070_v39, %v4996_v15 }
 0x46a   :  { %v1121_v11 = vadd.f32 %v4990_v63, %v1071_v52  ;;  %v1122_v8 = vadd.f32 %v4991_v57, %v1072_v17  ;;  %v1123_v35 = vadd.f32 %v4992_v0, %v1073_v46  ;;  %v1124_v44 = vadd.f32 %v4993_v33, %v1074_v55  ;;  %v3813_v33 = vld [vmem:[%s4963_s2 + $0x94] sm:$0xff]  }
 0x46b   :  { %v1125_v45 = vadd.f32 %v4994_v51, %v1075_v27  ;;  %v1126_v48 = vadd.f32 %v4995_v37, %v1076_v38  ;;  %v1127_v9 = vadd.f32 %v4997_v1, %v1077_v20  ;;  %v1183_v27 = vpop.permute.xlu1 %1182  ;;  %v3815_v51 = vld [vmem:[%s4963_s2 + $0xa4] ss:$0 sps:$4 sm:$0x11]  }
 0x46c   :  { %v1128_v4 = vmax.f32 %v1121_v11, 0.0  ;;  %v1129_v43 = vmax.f32 %v1122_v8, 0.0  ;;  %v1130_v62 = vmax.f32 %v1123_v35, 0.0  ;;  %v1131_v54 = vmax.f32 %v1124_v44, 0.0  ;;  %v3814_v44 = vld [vmem:[%s4963_s2 + $0x9c] sm:$0xff]  }
 0x46d   :  { %v1132_v25 = vmax.f32 %v1125_v45, 0.0  ;;  %v1133_v49 = vmax.f32 %v1126_v48, 0.0  ;;  %v1134_v26 = vmax.f32 %v1127_v9, 0.0  ;;  %v1322_v48 = vpop.permute.xlu0 %1321 }
 0x46e   :  { %v1143_v16 = vpack.c.bf16 %v1129_v43, %v1128_v4  ;;  %v1144_v56 = vpack.c.bf16 %v1131_v54, %v1130_v62 }
 0x46f   :  { %v1145_v59 = vpack.c.bf16 %v1133_v49, %v1132_v25  ;;  %v1146_v14 = vpack.c.bf16 %v1134_v26, %v1134_v26  ;;  %v1317_v45 = vpop.permute.xlu1 %1316 }
 0x470   :  { %3599 = vmatprep.subr.bf16.mxu0 %v1143_v16 }
 0x471   :  { %3600 = vmatpush3.bf16.msra.mxu0 %v1143_v16  ;;  %v1221_v47 = vsel %vm221_vm1, %v1146_v14, 0  ;;  %v1332_v62 = vpop.permute.xlu0 %1331 }
 0x472   :  { %3601 = vmatprep.subr.bf16.mxu0 %v1144_v56 }
 0x473   :  { %v1327_v37 = vpop.permute.xlu1 %1326 }
 0x475   :  { %3602 = vmatpush3.bf16.msra.mxu0 %v1144_v56 }
 0x476   :  { %3603 = vmatprep.subr.bf16.mxu0 %v1145_v59 }
 0x477   :  { %v1337_v20 = vpop.permute.xlu1 %1336 }
 0x479   :  { %3604 = vmatpush3.bf16.msra.mxu0 %v1145_v59 }
 0x47a   :  { %3779 = vmatprep.subr.msk.bf16.mxu0 %vm221_vm1, %v1146_v14 }
 0x47d   :  { %3606 = vmatpush3.bf16.msra.mxu0 %v1221_v47  ;;  %v1347_v47 = vpop.permute.xlu1 %1346 }
 0x47e   :  { %3631 = vmatprep.subr.bf16.mxu0 %v3855_v6 }
 0x480   :  { %3608 = vmatmul.mubr.msk.bf16.vlgmr.msra.gmra.mrb[20].mxu0 %vm208_vm0, %v3809_v22 }
 0x481   :  { %3611 = vmatprep.mubr.msk.bf16.mxu0 %vm208_vm0, %v3810_v3 }
 0x488   :  { %3612 = vmatmul.mubr.msk.bf16.gmra.mrb[24].mxu0 %vm208_vm0, %v3811_v12 }
 0x489   :  { %3639 = vmatprep.mubr.msk.bf16.mxu0 %vm3856_vm2, %v3855_v6 }
 0x553   :  { %v3609_v31 = vpop.f32.mrb[20].mxu0 }
 0x554   :  { %v1266_v5 = vadd.f32 %v3609_v31, %v4998_v32  ;;  %v1257_v53 = vpop.f32.mrb[21].mxu0 }
 0x555   :  { %v1258_v58 = vadd.f32 %v1257_v53, %v4999_v21  ;;  %v3610_v36 = vpop.f32.mrb[22].mxu0 }
 0x556   :  { %v1269_v60 = vadd.f32 %v3610_v36, %v5000_v13  ;;  %v1260_v61 = vpop.f32.mrb[23].mxu0  ;;  %v1289_v24 = vmax.f32 %v1266_v5, 0.0  ;;  %v1342_v5 = vpop.permute.xlu0 %1341 }
 0x557   :  { %v1261_v41 = vadd.f32 %v1260_v61, %v5001_v10  ;;  %v1287_v40 = vmax.f32 %v1258_v58, 0.0  ;;  %v3199_v10 = vld [vmem:[%s4966_s3 + $0x4] sm:$0x3] }
 0x558   :  { %v1290_v18 = vmax.f32 %v1269_v60, 0.0 }
 0x559   :  { %v1288_v39 = vmax.f32 %v1261_v41, 0.0  ;;  %v3816_v41 = vld [vmem:[%s4963_s2 + $0xa8] sm:$0xff]  }
 0x55a   :  { %v1303_v52 = vpack.c.bf16 %v1290_v18, %v1289_v24  ;;  %v1464_v24 = vpop.permute.xlu0 %1463  ;;  %v1537_v18 = vpop.permute.xlu1 %1536 }
 0x55b   :  { %v1302_v28 = vpack.c.bf16 %v1288_v39, %v1287_v40  ;;  %v3613_v17 = vpop.f32.mrb[24].mxu0 }
 0x55c   :  { %v1273_v46 = vpop.f32.mrb[25].mxu0  ;;  %v1282_v23 = vadd.f32 %v3613_v17, %v1188_v29 }
 0x55d   :  { %v1274_v55 = vadd.f32 %v1273_v46, %v1178_v7  ;;  %v3614_v34 = vpop.f32.mrb[26].mxu0  ;;  %3615 = vmatprep.subr.bf16.mxu1 %v1302_v28 }
 0x55e   :  { %v1276_v42 = vpop.f32.mrb[27].mxu0  ;;  %3616 = vmatpush3.bf16.msra.mxu1 %v1302_v28  ;;  %v1293_v63 = vmax.f32 %v1282_v23, 0.0  ;;  %v1542_v40 = vpop.permute.xlu0 %1541 }
 0x55f   :  { %v1277_v38 = vadd.f32 %v1276_v42, %v1183_v27  ;;  %3617 = vmatprep.subr.bf16.mxu1 %v1303_v52  ;;  %v1291_v11 = vmax.f32 %v1274_v55, 0.0  ;;  %v1591_v39 = vpop.permute.xlu1 %1590 }
 0x560   :  { %v1305_v0 = vpack.c.bf16 %v1293_v63, %v1293_v63 }
 0x561   :  { %v1292_v57 = vmax.f32 %v1277_v38, 0.0 }
 0x562   :  { %3618 = vmatpush3.bf16.msra.mxu1 %v1303_v52  ;;  %v1380_v35 = vsel %vm221_vm1, %v1305_v0, 0  ;;  %v1596_v28 = vpop.permute.xlu0 %1595 }
 0x563   :  { %v1304_v8 = vpack.c.bf16 %v1292_v57, %v1291_v11  ;;  %v1547_v46 = vpop.permute.xlu1 %1546 }
 0x565   :  { %3619 = vmatprep.subr.bf16.mxu1 %v1304_v8 }
 0x566   :  { %3620 = vmatpush3.bf16.msra.mxu1 %v1304_v8  ;;  %v1552_v27 = vpop.permute.xlu0 %1551 }
 0x567   :  { %3780 = vmatprep.subr.msk.bf16.mxu1 %vm221_vm1, %v1305_v0  ;;  %v1601_v42 = vpop.permute.xlu1 %1600 }
 0x56a   :  { %3622 = vmatpush3.bf16.msra.mxu1 %v1380_v35  ;;  %v1606_v38 = vpop.permute.xlu0 %1605  ;;  %v3852_v35 = vld [vmem:[%s4965_s0] sm:$0x1] }
 0x56b   :  { %v1557_v63 = vpop.permute.xlu1 %1556 }
 0x56d   :  { %3624 = vmatmul.mubr.msk.bf16.vlgmr.msra.gmra.mrb[20].mxu1 %vm208_vm0, %v3813_v33 }
 0x56e   :  { %3627 = vmatprep.mubr.msk.bf16.mxu1 %vm208_vm0, %v3814_v44 }
 0x575   :  { %3628 = vmatmul.mubr.msk.bf16.gmra.mrb[24].mxu1 %vm208_vm0, %v3815_v51  ;;  %v1562_v51 = vpop.permute.xlu0 %1561 }
 0x576   :  { %3651 = vmatprep.mubr.msk.bf16.mxu1 %vm208_vm0, %v3816_v41  ;;  %v3820_v41 = vld [vmem:[%s4963_s2 + $0xc4] sm:$0xff]  }
 0x640   :  { %v3625_v15 = vpop.f32.mrb[20].mxu1 }
 0x641   :  { %v1425_v4 = vadd.f32 %v3625_v15, %v1327_v37  ;;  %v1416_v43 = vpop.f32.mrb[21].mxu1 }
 0x642   :  { %v1417_v54 = vadd.f32 %v1416_v43, %v1317_v45  ;;  %v3626_v16 = vpop.f32.mrb[22].mxu1  ;;  %v1611_v45 = vpop.permute.xlu1 %1610 }
 0x643   :  { %v1428_v56 = vadd.f32 %v3626_v16, %v1332_v62  ;;  %v1419_v25 = vpop.f32.mrb[23].mxu1  ;;  %v1448_v1 = vmax.f32 %v1425_v4, 0.0  ;;  %v1616_v62 = vpop.permute.xlu0 %1615 }
 0x644   :  { %v1420_v49 = vadd.f32 %v1419_v25, %v1322_v48  ;;  %v1446_v59 = vmax.f32 %v1417_v54, 0.0 }
 0x645   :  { %v1449_v9 = vmax.f32 %v1428_v56, 0.0 }
 0x646   :  { %v1447_v26 = vmax.f32 %v1420_v49, 0.0  ;;  %v1567_v56 = vpop.permute.xlu1 %1566 }
 0x647   :  { %v1456_v14 = vpack.c.bf16 %v1449_v9, %v1448_v1 }
 0x648   :  { %v1455_v22 = vpack.c.bf16 %v1447_v26, %v1446_v59  ;;  %v3629_v3 = vpop.f32.mrb[24].mxu1 }
 0x649   :  { %v1441_v12 = vadd.f32 %v3629_v3, %v1347_v47  ;;  %v1432_v19 = vpop.f32.mrb[25].mxu1 }
 0x64a   :  { %v1433_v31 = vadd.f32 %v1432_v19, %v1337_v20  ;;  %v3630_v32 = vpop.f32.mrb[26].mxu1  ;;  %3632 = vmatpush3.bf16.msra.mxu0 %v1455_v22 }
 0x64b   :  { %v1435_v53 = vpop.f32.mrb[27].mxu1  ;;  %3633 = vmatprep.subr.bf16.mxu0 %v3855_v6  ;;  %v1452_v58 = vmax.f32 %v1441_v12, 0.0 }
 0x64c   :  { %v1436_v21 = vadd.f32 %v1435_v53, %v1342_v5  ;;  %v1450_v36 = vmax.f32 %v1433_v31, 0.0  ;;  %v1621_v31 = vpop.permute.xlu0 %1620 }
 0x64d   :  { %v1458_v60 = vpack.c.bf16 %v1452_v58, %v1452_v58 }
 0x64e   :  { %v1451_v7 = vmax.f32 %v1436_v21, 0.0  ;;  %3634 = vmatpush3.bf16.msra.mxu0 %v1456_v14 }
 0x64f   :  { %3635 = vmatprep.subr.bf16.mxu0 %v3855_v6  ;;  %v1470_v61 = vsel %vm221_vm1, %v1458_v60, 0  ;;  %v3817_v60 = vld [vmem:[%s4963_s2 + $0xb0] sm:$0xff]  }
 0x650   :  { %v1457_v13 = vpack.c.bf16 %v1451_v7, %v1450_v36 }
 0x652   :  { %3636 = vmatpush3.bf16.msra.mxu0 %v1457_v13 }
 0x653   :  { %3637 = vmatprep.subr.bf16.mxu0 %v3855_v6 }
 0x656   :  { %3638 = vmatpush3.bf16.msra.mxu0 %v1470_v61  ;;  %v3818_v61 = vld [vmem:[%s4963_s2 + $0xb8] sm:$0xff]  }
 0x659   :  { %3640 = vmatmul.mubr.msk.bf16.vlgmr.msra.gmra.mrb[28].mxu0 %vm208_vm0, %v3199_v10  ;;  %v3819_v10 = vld [vmem:[%s4963_s2 + $0xc0] ss:$0 sps:$4 sm:$0x11]  }
 0x65a   :  { %3667 = vmatprep.mubr.msk.bf16.mxu0 %vm208_vm0, %v3820_v41 }
 0x72c   :  { %v1506_v52 = vpop.f32.mrb[28].mxu0 }
 0x72d   :  { %v1507_v17 = vadd.f32 %v1506_v52, %v1464_v24  ;;  %v3641_v29 = vpop.f32.mrb[29].mxu0  ;;  %v1660_v24 = vpop.permute.xlu1 %1659 }
 0x72e   :  { %v1509_v23 = vpop.f32.mrb[30].mxu0 }
 0x72f   :  { %v1512_v55 = vmul.f32 1.442695, %v1507_v17  ;;  %v3642_v34 = vpop.f32.mrb[31].mxu0  ;;  %v1523_v44 = vrot.slane %v1507_v17, 1 }
 0x731   :  { %3844 = vpow2.f32 %v1512_v55 }
 0x73b   :  { %v3845_v11 = vpop.eup %3844 }
 0x73c   :  { %v1515_v57 = vrot.slane %v3845_v11, 2  ;;  %v1519_v8 = vrot.slane %v3845_v11, 3 }
 0x73e   :  { %v1517_v0 = vmul.f32 %v1515_v57, %v4709_v30  ;;  %v1521_v33 = vmul.f32 %v3852_v35, %v1519_v8 }
 0x740   :  { %v4782_v37 = vadd.f32 %v1517_v0, %v1507_v17  ;;  %v4784_v48 = vadd.f32 %v1523_v44, %v1521_v33 }
 0x742   :  { %v4788_v15 = vrot.slane %v4784_v48, %v4082_v2 }
 0x744   :  { %v1573_v20 = vmul.f32 %v4788_v15, %v1537_v18  ;;  %v1574_v30 = vmul.f32 %v4788_v15, %v1542_v40  ;;  %v1575_v4 = vmul.f32 %v4788_v15, %v1547_v46  ;;  %v1576_v43 = vmul.f32 %v4788_v15, %v1552_v27  ;;  %v1665_v18 = vpop.permute.xlu0 %1664  ;;  %v1670_v40 = vpop.permute.xlu1 %1669 }
 0x745   :  { %v1577_v54 = vmul.f32 %v4788_v15, %v1557_v63  ;;  %v1578_v16 = vmul.f32 %v4788_v15, %v1562_v51  ;;  %v1579_v14 = vmul.f32 %v4788_v15, %v1567_v56 }
 0x746   :  { %v1623_v25 = vadd.f32 %v1591_v39, %v1573_v20  ;;  %v1624_v49 = vadd.f32 %v1596_v28, %v1574_v30  ;;  %v1625_v1 = vadd.f32 %v1601_v42, %v1575_v4  ;;  %v1626_v9 = vadd.f32 %v1606_v38, %v1576_v43 }
 0x747   :  { %v1627_v59 = vadd.f32 %v1611_v45, %v1577_v54  ;;  %v1628_v26 = vadd.f32 %v1616_v62, %v1578_v16  ;;  %v1629_v21 = vadd.f32 %v1621_v31, %v1579_v14 }
 0x748   :  { %v1630_v47 = vmax.f32 %v1623_v25, 0.0  ;;  %v1631_v22 = vmax.f32 %v1624_v49, 0.0  ;;  %v1632_v3 = vmax.f32 %v1625_v1, 0.0  ;;  %v1633_v12 = vmax.f32 %v1626_v9, 0.0  ;;  %v1675_v39 = vpop.permute.xlu0 %1674  ;;  %v1680_v52 = vpop.permute.xlu1 %1679 }
 0x749   :  { %v1634_v5 = vmax.f32 %v1627_v59, 0.0  ;;  %v1635_v53 = vmax.f32 %v1628_v26, 0.0  ;;  %v1636_v36 = vmax.f32 %v1629_v21, 0.0 }
 0x74a   :  { %v1645_v19 = vpack.c.bf16 %v1631_v22, %v1630_v47  ;;  %v1646_v32 = vpack.c.bf16 %v1633_v12, %v1632_v3 }
 0x74b   :  { %v1647_v58 = vpack.c.bf16 %v1635_v53, %v1634_v5  ;;  %v1648_v7 = vpack.c.bf16 %v1636_v36, %v1636_v36 }
 0x74c   :  { %3643 = vmatprep.subr.bf16.mxu1 %v1645_v19  ;;  %v1685_v28 = vpop.permute.xlu0 %1684  ;;  %v1690_v17 = vpop.permute.xlu1 %1689 }
 0x74d   :  { %3644 = vmatpush3.bf16.msra.mxu1 %v1645_v19  ;;  %v1723_v13 = vsel %vm221_vm1, %v1648_v7, 0 }
 0x74e   :  { %3645 = vmatprep.subr.bf16.mxu1 %v1646_v32 }
 0x750   :  { %v2039_v29 = vpop.permute.xlu0 %2038  ;;  %v2044_v46 = vpop.permute.xlu1 %2043 }
 0x751   :  { %3646 = vmatpush3.bf16.msra.mxu1 %v1646_v32  ;;  %v2071_v56 = vmul.f32 %v2039_v29, %v4788_v15  ;;  %v2072_v25 = vmul.f32 %v2044_v46, %v4788_v15  ;;  %v3822_v46 = vld [vmem:[%s4963_s2 + $0xd4] sm:$0xff]  }
 0x752   :  { %3647 = vmatprep.subr.bf16.mxu1 %v1647_v58 }
 0x754   :  { %v2089_v23 = vpop.permute.xlu0 %2088  ;;  %v2094_v55 = vpop.permute.xlu1 %2093 }
 0x755   :  { %3648 = vmatpush3.bf16.msra.mxu1 %v1647_v58  ;;  %v2121_v47 = vadd.f32 %v2089_v23, %v2071_v56  ;;  %v2122_v22 = vadd.f32 %v2094_v55, %v2072_v25 }
 0x756   :  { %3781 = vmatprep.subr.msk.bf16.mxu1 %vm221_vm1, %v1648_v7 }
 0x757   :  { %v2128_v21 = vmax.f32 %v2121_v47, 0.0  ;;  %v2129_v58 = vmax.f32 %v2122_v22, 0.0 }
 0x758   :  { %v2049_v34 = vpop.permute.xlu0 %2048  ;;  %v2054_v42 = vpop.permute.xlu1 %2053 }
 0x759   :  { %3650 = vmatpush3.bf16.msra.mxu1 %v1723_v13  ;;  %v2073_v3 = vmul.f32 %v2049_v34, %v4788_v15  ;;  %v2074_v5 = vmul.f32 %v2054_v42, %v4788_v15 }
 0x75a   :  { %3675 = vmatprep.subr.bf16.mxu1 %v3855_v6 }
 0x75c   :  { %3652 = vmatmul.mubr.msk.bf16.vlgmr.msra.gmra.mrb[28].mxu1 %vm208_vm0, %v3817_v60  ;;  %v2099_v11 = vpop.permute.xlu0 %2098  ;;  %v2104_v30 = vpop.permute.xlu1 %2103 }
 0x75d   :  { %3655 = vmatprep.mubr.msk.bf16.mxu1 %vm208_vm0, %v3818_v61  ;;  %v2123_v36 = vadd.f32 %v2099_v11, %v2073_v3  ;;  %v2124_v13 = vadd.f32 %v2104_v30, %v2074_v5  ;;  %v3824_v11 = vld [vmem:[%s4963_s2 + $0xe0] sm:$0xff]  }
 0x760   :  { %v2059_v43 = vpop.permute.xlu0 %2058  ;;  %v2064_v14 = vpop.permute.xlu1 %2063 }
 0x761   :  { %v2075_v60 = vmul.f32 %v2059_v43, %v4788_v15  ;;  %v2076_v61 = vmul.f32 %v2064_v14, %v4788_v15 }
 0x764   :  { %3656 = vmatmul.mubr.msk.bf16.gmra.mrb[32].mxu1 %vm208_vm0, %v3819_v10  ;;  %v2109_v12 = vpop.permute.xlu0 %2108  ;;  %v2114_v10 = vpop.permute.xlu1 %2113 }
 0x765   :  { %3683 = vmatprep.mubr.msk.bf16.mxu1 %vm3856_vm2, %v3855_v6  ;;  %v2126_v29 = vadd.f32 %v2114_v10, %v2076_v61 }
 0x767   :  { %v2133_v34 = vmax.f32 %v2126_v29, 0.0 }
 0x768   :  { %v2069_v41 = vpop.permute.xlu0 %2068  ;;  %v2119_v23 = vpop.permute.xlu1 %2118 }
 0x82f   :  { %v3653_v27 = vpop.f32.mrb[28].mxu1 }
 0x830   :  { %v1768_v38 = vadd.f32 %v3653_v27, %v1670_v40  ;;  %v1759_v63 = vpop.f32.mrb[29].mxu1  ;;  %v2077_v40 = vmul.f32 %v2069_v41, %v4788_v15 }
 0x831   :  { %v1760_v57 = vadd.f32 %v1759_v63, %v1660_v24  ;;  %v3654_v8 = vpop.f32.mrb[30].mxu1  ;;  %v2143_v24 = vpack.c.bf16 %v2129_v58, %v2128_v21 }
 0x832   :  { %v1771_v0 = vadd.f32 %v3654_v8, %v1675_v39  ;;  %v1762_v35 = vpop.f32.mrb[31].mxu1  ;;  %v1791_v44 = vmax.f32 %v1768_v38, 0.0  ;;  %v2127_v27 = vadd.f32 %v2119_v23, %v2077_v40  ;;  %v3823_v38 = vld [vmem:[%s4963_s2 + $0xdc] ss:$0 sps:$4 sm:$0x11]  }
 0x833   :  { %v1763_v33 = vadd.f32 %v1762_v35, %v1665_v18  ;;  %v1789_v45 = vmax.f32 %v1760_v57, 0.0  ;;  %v2130_v18 = vmax.f32 %v2123_v36, 0.0  ;;  %v3826_v35 = vld [vmem:[%s4963_s2 + $0xf0] sm:$0xff]  }
 0x834   :  { %v1792_v51 = vmax.f32 %v1771_v0, 0.0  ;;  %v2134_v63 = vmax.f32 %v2127_v27, 0.0  ;;  %v3825_v0 = vld [vmem:[%s4963_s2 + $0xe8] sm:$0xff]  }
 0x835   :  { %v1790_v20 = vmax.f32 %v1763_v33, 0.0  ;;  %v3827_v33 = vld [vmem:[%s4963_s2 + $0xf8] ss:$0 sps:$4 sm:$0x11]  }
 0x836   :  { %v1805_v4 = vpack.c.bf16 %v1792_v51, %v1791_v44  ;;  %v2146_v57 = vpack.c.bf16 %v2134_v63, %v2134_v63  ;;  %v1819_v44 = vpop.permute.xlu0 %1818  ;;  %v1824_v51 = vpop.permute.xlu1 %1823  ;;  %v3828_v63 = vld [vmem:[%s4963_s2 + $0xfc] sm:$0xff]  }
 0x837   :  { %v1804_v62 = vpack.c.bf16 %v1790_v20, %v1789_v45  ;;  %v3657_v54 = vpop.f32.mrb[32].mxu1 }
 0x838   :  { %v1775_v16 = vpop.f32.mrb[33].mxu1  ;;  %v1784_v49 = vadd.f32 %v3657_v54, %v1690_v17  ;;  %v2125_v17 = vadd.f32 %v2109_v12, %v2075_v60  ;;  %v2221_v8 = vsel %vm221_vm1, %v2146_v57, 0 }
 0x839   :  { %v1776_v1 = vadd.f32 %v1775_v16, %v1680_v52  ;;  %v3658_v9 = vpop.f32.mrb[34].mxu1  ;;  %3659 = vmatprep.subr.bf16.mxu0 %v1804_v62  ;;  %v3821_v52 = vld [vmem:[%s4963_s2 + $0xcc] sm:$0xff]  }
 0x83a   :  { %v1778_v59 = vpop.f32.mrb[35].mxu1  ;;  %3660 = vmatpush3.bf16.msra.mxu0 %v1804_v62  ;;  %v1795_v19 = vmax.f32 %v1784_v49, 0.0  ;;  %v2132_v15 = vmax.f32 %v2125_v17, 0.0  ;;  %v1829_v45 = vpop.permute.xlu0 %1828 }
 0x83b   :  { %v1779_v26 = vadd.f32 %v1778_v59, %v1685_v28  ;;  %3661 = vmatprep.subr.bf16.mxu0 %v1805_v4  ;;  %v1793_v31 = vmax.f32 %v1776_v1, 0.0  ;;  %v2131_v28 = vmax.f32 %v2124_v13, 0.0  ;;  %v1834_v20 = vpop.permute.xlu1 %1833 }
 0x83c   :  { %v1807_v7 = vpack.c.bf16 %v1795_v19, %v1795_v19  ;;  %v2145_v42 = vpack.c.bf16 %v2133_v34, %v2132_v15 }
 0x83d   :  { %v1794_v32 = vmax.f32 %v1779_v26, 0.0  ;;  %v2144_v55 = vpack.c.bf16 %v2131_v28, %v2130_v18 }
 0x83e   :  { %3662 = vmatpush3.bf16.msra.mxu0 %v1805_v4  ;;  %v1882_v39 = vsel %vm221_vm1, %v1807_v7, 0  ;;  %v1839_v30 = vpop.permute.xlu0 %1838 }
 0x83f   :  { %v1806_v53 = vpack.c.bf16 %v1794_v32, %v1793_v31  ;;  %v1844_v43 = vpop.permute.xlu1 %1843 }
 0x841   :  { %3663 = vmatprep.subr.bf16.mxu0 %v1806_v53 }
 0x842   :  { %3664 = vmatpush3.bf16.msra.mxu0 %v1806_v53  ;;  %v1849_v26 = vpop.permute.xlu0 %1848 }
 0x843   :  { %3782 = vmatprep.subr.msk.bf16.mxu0 %vm221_vm1, %v1807_v7  ;;  %v2158_v22 = vpop.permute.xlu1 %2157 }
 0x846   :  { %3666 = vmatpush3.bf16.msra.mxu0 %v1882_v39  ;;  %v2163_v58 = vpop.permute.xlu0 %2162 }
 0x847   :  { %3687 = vmatprep.subr.bf16.mxu0 %v2143_v24  ;;  %v2168_v7 = vpop.permute.xlu1 %2167 }
 0x849   :  { %3668 = vmatmul.mubr.msk.bf16.vlgmr.msra.gmra.mrb[32].mxu0 %vm208_vm0, %v3821_v52 }
 0x84a   :  { %3688 = vmatpush3.bf16.msra.mxu0 %v2143_v24  ;;  %3671 = vmatprep.mubr.msk.bf16.mxu0 %vm208_vm0, %v3822_v46  ;;  %v2173_v39 = vpop.permute.xlu0 %2172 }
 0x84b   :  { %3689 = vmatprep.subr.bf16.mxu0 %v2144_v55  ;;  %v2178_v17 = vpop.permute.xlu1 %2177 }
 0x84e   :  { %3690 = vmatpush3.bf16.msra.mxu0 %v2144_v55 }
 0x84f   :  { %3691 = vmatprep.subr.bf16.mxu0 %v2145_v42 }
 0x851   :  { %3672 = vmatmul.mubr.msk.bf16.gmra.mrb[36].mxu0 %vm208_vm0, %v3823_v38  ;;  %v3260_v38 = vld [vmem:[%s4966_s3 + $0x6] sm:$0x3] }
 0x852   :  { %3692 = vmatpush3.bf16.msra.mxu0 %v2145_v42  ;;  %3695 = vmatprep.mubr.msk.bf16.mxu0 %vm208_vm0, %v3824_v11 }
 0x853   :  { %3783 = vmatprep.subr.msk.bf16.mxu0 %vm221_vm1, %v2146_v57 }
 0x856   :  { %3694 = vmatpush3.bf16.msra.mxu0 %v2221_v8 }
 0x857   :  { %3719 = vmatprep.subr.bf16.mxu0 %v3855_v6 }
 0x859   :  { %3696 = vmatmul.mubr.msk.bf16.vlgmr.msra.gmra.mrb[40].mxu0 %vm208_vm0, %v3825_v0  ;;  %v2188_v0 = vpop.permute.xlu1 %2187 }
 0x85a   :  { %3699 = vmatprep.mubr.msk.bf16.mxu0 %vm208_vm0, %v3826_v35 }
 0x861   :  { %3700 = vmatmul.mubr.msk.bf16.gmra.mrb[44].mxu0 %vm208_vm0, %v3827_v33 }
 0x862   :  { %3727 = vmatprep.mubr.msk.bf16.mxu0 %vm3856_vm2, %v3855_v6 }
 0x91c   :  { %v3669_v4 = vpop.f32.mrb[32].mxu0 }
 0x91d   :  { %v1927_v62 = vadd.f32 %v3669_v4, %v1829_v45  ;;  %v1918_v54 = vpop.f32.mrb[33].mxu0  ;;  %v2183_v45 = vpop.permute.xlu0 %2182 }
 0x91e   :  { %v1919_v16 = vadd.f32 %v1918_v54, %v1819_v44  ;;  %v3670_v56 = vpop.f32.mrb[34].mxu0 }
 0x91f   :  { %v1930_v25 = vadd.f32 %v3670_v56, %v1834_v20  ;;  %v1921_v49 = vpop.f32.mrb[35].mxu0  ;;  %v1950_v9 = vmax.f32 %v1927_v62, 0.0 }
 0x920   :  { %v1922_v1 = vadd.f32 %v1921_v49, %v1824_v51  ;;  %v1948_v14 = vmax.f32 %v1919_v16, 0.0  ;;  %v3830_v49 = vld [vmem:[%s4963_s2 + $0x10c] sm:$0xff]  }
 0x921   :  { %v1951_v59 = vmax.f32 %v1930_v25, 0.0  ;;  %v3829_v25 = vld [vmem:[%s4963_s2 + $0x104] sm:$0xff]  }
 0x922   :  { %v1949_v47 = vmax.f32 %v1922_v1, 0.0  ;;  %v3831_v1 = vld [vmem:[%s4963_s2 + $0x114] ss:$0 sps:$4 sm:$0x11]  }
 0x923   :  { %v1958_v3 = vpack.c.bf16 %v1951_v59, %v1950_v9  ;;  %v2322_v9 = vpop.permute.xlu1 %2321 }
 0x924   :  { %v1957_v12 = vpack.c.bf16 %v1949_v47, %v1948_v14  ;;  %v3673_v19 = vpop.f32.mrb[36].mxu0 }
 0x925   :  { %v1943_v31 = vadd.f32 %v3673_v19, %v1849_v26  ;;  %v1934_v32 = vpop.f32.mrb[37].mxu0 }
 0x926   :  { %v1935_v5 = vadd.f32 %v1934_v32, %v1839_v30  ;;  %v3674_v53 = vpop.f32.mrb[38].mxu0  ;;  %3676 = vmatpush3.bf16.msra.mxu1 %v1957_v12  ;;  %v2317_v32 = vpop.permute.xlu0 %2316 }
 0x927   :  { %v1937_v21 = vpop.f32.mrb[39].mxu0  ;;  %3677 = vmatprep.subr.bf16.mxu1 %v3855_v6  ;;  %v1954_v13 = vmax.f32 %v1943_v31, 0.0  ;;  %v2332_v59 = vpop.permute.xlu1 %2331 }
 0x928   :  { %v1938_v36 = vadd.f32 %v1937_v21, %v1844_v43  ;;  %v1952_v60 = vmax.f32 %v1935_v5, 0.0 }
 0x929   :  { %v1960_v24 = vpack.c.bf16 %v1954_v13, %v1954_v13 }
 0x92a   :  { %v1953_v61 = vmax.f32 %v1938_v36, 0.0  ;;  %3678 = vmatpush3.bf16.msra.mxu1 %v1958_v3  ;;  %v2327_v5 = vpop.permute.xlu0 %2326 }
 0x92b   :  { %3679 = vmatprep.subr.bf16.mxu1 %v3855_v6  ;;  %v1972_v34 = vsel %vm221_vm1, %v1960_v24, 0  ;;  %v2342_v26 = vpop.permute.xlu1 %2341 }
 0x92c   :  { %v1959_v10 = vpack.c.bf16 %v1953_v61, %v1952_v60  ;;  %v3697_v41 = vpop.f32.mrb[40].mxu0 }
 0x92d   :  { %v2266_v18 = vadd.f32 %v3697_v41, %v2168_v7  ;;  %v2257_v40 = vpop.f32.mrb[41].mxu0 }
 0x92e   :  { %v2258_v52 = vadd.f32 %v2257_v40, %v2158_v22  ;;  %3680 = vmatpush3.bf16.msra.mxu1 %v1959_v10  ;;  %v3698_v28 = vpop.f32.mrb[42].mxu0  ;;  %v2337_v61 = vpop.permute.xlu0 %2336 }
 0x92f   :  { %v2269_v29 = vadd.f32 %v3698_v28, %v2173_v39  ;;  %v2260_v46 = vpop.f32.mrb[43].mxu0  ;;  %3681 = vmatprep.subr.bf16.mxu1 %v3855_v6  ;;  %v2289_v55 = vmax.f32 %v2266_v18, 0.0  ;;  %v1966_v14 = vpop.permute.xlu1 %1965 }
 0x930   :  { %v2261_v23 = vadd.f32 %v2260_v46, %v2163_v58  ;;  %v2287_v27 = vmax.f32 %v2258_v52, 0.0 }
 0x931   :  { %v2290_v15 = vmax.f32 %v2269_v29, 0.0 }
 0x932   :  { %v2288_v42 = vmax.f32 %v2261_v23, 0.0  ;;  %3682 = vmatpush3.bf16.msra.mxu1 %v1972_v34  ;;  %v2347_v23 = vpop.permute.xlu0 %2346 }
 0x933   :  { %v2303_v11 = vpack.c.bf16 %v2290_v15, %v2289_v55 }
 0x934   :  { %v2302_v57 = vpack.c.bf16 %v2288_v42, %v2287_v27  ;;  %v3701_v8 = vpop.f32.mrb[44].mxu0 }
 0x935   :  { %3684 = vmatmul.mubr.msk.bf16.vlgmr.msra.gmra.mrb[36].mxu1 %vm208_vm0, %v3260_v38  ;;  %v2273_v35 = vpop.f32.mrb[45].mxu0  ;;  %v2282_v33 = vadd.f32 %v3701_v8, %v2188_v0 }
 0x936   :  { %v2274_v44 = vadd.f32 %v2273_v35, %v2178_v17  ;;  %v3702_v51 = vpop.f32.mrb[46].mxu0  ;;  %3703 = vmatprep.subr.bf16.mxu1 %v2302_v57  ;;  %3711 = vmatprep.mubr.msk.bf16.mxu1 %vm208_vm0, %v3828_v63 }
 0x937   :  { %v2276_v20 = vpop.f32.mrb[47].mxu0  ;;  %3704 = vmatpush3.bf16.msra.mxu1 %v2302_v57  ;;  %v2293_v4 = vmax.f32 %v2282_v33, 0.0  ;;  %v3832_v51 = vld [vmem:[%s4963_s2 + $0x118] sm:$0xff]  }
 0x938   :  { %v2277_v30 = vadd.f32 %v2276_v20, %v2183_v45  ;;  %3705 = vmatprep.subr.bf16.mxu1 %v2303_v11  ;;  %v2291_v43 = vmax.f32 %v2274_v44, 0.0  ;;  %v3321_v44 = vld [vmem:[%s4966_s3 + $0x8] sm:$0x3]  ;;  %v2464_v45 = vpop.permute.xlu0 %2463  ;;  %v2537_v20 = vpop.permute.xlu1 %2536 }
 0x939   :  { %v2305_v16 = vpack.c.bf16 %v2293_v4, %v2293_v4 }
 0x93a   :  { %v2292_v62 = vmax.f32 %v2277_v30, 0.0 }
 0x93b   :  { %3706 = vmatpush3.bf16.msra.mxu1 %v2303_v11  ;;  %v2380_v56 = vsel %vm221_vm1, %v2305_v16, 0 }
 0x93c   :  { %v2304_v54 = vpack.c.bf16 %v2292_v62, %v2291_v43  ;;  %v2542_v30 = vpop.permute.xlu0 %2541  ;;  %v2591_v4 = vpop.permute.xlu1 %2590 }
 0x93e   :  { %3707 = vmatprep.subr.bf16.mxu1 %v2304_v54 }
 0x93f   :  { %3708 = vmatpush3.bf16.msra.mxu1 %v2304_v54 }
 0x940   :  { %3784 = vmatprep.subr.msk.bf16.mxu1 %vm221_vm1, %v2305_v16  ;;  %v2596_v62 = vpop.permute.xlu0 %2595 }
 0x943   :  { %3710 = vmatpush3.bf16.msra.mxu1 %v2380_v56  ;;  %v2547_v56 = vpop.permute.xlu1 %2546 }
 0x946   :  { %3712 = vmatmul.mubr.msk.bf16.vlgmr.msra.gmra.mrb[40].mxu1 %vm208_vm0, %v3829_v25 }
 0x947   :  { %3715 = vmatprep.mubr.msk.bf16.mxu1 %vm208_vm0, %v3830_v49 }
 0x94e   :  { %3716 = vmatmul.mubr.msk.bf16.gmra.mrb[44].mxu1 %vm208_vm0, %v3831_v1 }
 0x94f   :  { %3739 = vmatprep.mubr.msk.bf16.mxu1 %vm208_vm0, %v3832_v51  ;;  %v3835_v51 = vld [vmem:[%s4963_s2 + $0x130] ss:$0 sps:$4 sm:$0x11]  }
 0xa08   :  { %v2008_v47 = vpop.f32.mrb[36].mxu1 }
 0xa09   :  { %v4886_v22 = vadd.f32 %v2008_v47, %v1966_v14  ;;  %v3685_v3 = vpop.f32.mrb[37].mxu1 }
 0xa0a   :  { %v2011_v12 = vpop.f32.mrb[38].mxu1 }
 0xa0b   :  { %v2014_v19 = vmul.f32 1.442695, %v4886_v22  ;;  %v3686_v31 = vpop.f32.mrb[39].mxu1  ;;  %v2025_v7 = vrot.slane %v4886_v22, 1 }
 0xa0d   :  { %3846 = vpow2.f32 %v2014_v19 }
 0xa17   :  { %v3847_v53 = vpop.eup %3846 }
 0xa18   :  { %v2021_v21 = vrot.slane %v3847_v53, 3 }
 0xa19   :  { %v3713_v58 = vpop.f32.mrb[40].mxu1 }
 0xa1a   :  { %v2023_v36 = vmul.f32 %v2021_v21, %v4782_v37  ;;  %v2425_v13 = vadd.f32 %v3713_v58, %v2327_v5  ;;  %v2416_v60 = vpop.f32.mrb[41].mxu1 }
 0xa1b   :  { %v2417_v10 = vadd.f32 %v2416_v60, %v2317_v32  ;;  %v3714_v41 = vpop.f32.mrb[42].mxu1 }
 0xa1c   :  { %v2027_v24 = vadd.f32 %v2025_v7, %v2023_v36  ;;  %v2428_v18 = vadd.f32 %v3714_v41, %v2332_v59  ;;  %v2419_v40 = vpop.f32.mrb[43].mxu1  ;;  %v2448_v52 = vmax.f32 %v2425_v13, 0.0  ;;  %v2601_v59 = vpop.permute.xlu1 %2600 }
 0xa1d   :  { %v2420_v39 = vadd.f32 %v2419_v40, %v2322_v9  ;;  %v2446_v17 = vmax.f32 %v2417_v10, 0.0  ;;  %v2552_v9 = vpop.permute.xlu0 %2551 }
 0xa1e   :  { %v2449_v28 = vmax.f32 %v2428_v18, 0.0 }
 0xa1f   :  { %v2447_v29 = vmax.f32 %v2420_v39, 0.0 }
 0xa20   :  { %v2456_v46 = vpack.c.bf16 %v2449_v28, %v2448_v52  ;;  %v2557_v3 = vpop.permute.xlu1 %2556 }
 0xa21   :  { %v2455_v55 = vpack.c.bf16 %v2447_v29, %v2446_v17  ;;  %v3717_v15 = vpop.f32.mrb[44].mxu1  ;;  %v2606_v47 = vpop.permute.xlu0 %2605 }
 0xa22   :  { %v2441_v37 = vadd.f32 %v3717_v15, %v2347_v23  ;;  %v2432_v34 = vpop.f32.mrb[45].mxu1 }
 0xa23   :  { %v2433_v27 = vadd.f32 %v2432_v34, %v2337_v61  ;;  %v3718_v42 = vpop.f32.mrb[46].mxu1  ;;  %3720 = vmatpush3.bf16.msra.mxu0 %v2455_v55 }
 0xa24   :  { %v2435_v38 = vpop.f32.mrb[47].mxu1  ;;  %3721 = vmatprep.subr.bf16.mxu0 %v3855_v6  ;;  %v2452_v11 = vmax.f32 %v2441_v37, 0.0  ;;  %v2611_v7 = vpop.permute.xlu1 %2610 }
 0xa25   :  { %v2436_v63 = vadd.f32 %v2435_v38, %v2342_v26  ;;  %v2450_v57 = vmax.f32 %v2433_v27, 0.0  ;;  %v2017_v26 = vrot.slane %v3847_v53, 2  ;;  %v2562_v36 = vpop.permute.xlu0 %2561 }
 0xa26   :  { %v2458_v35 = vpack.c.bf16 %v2452_v11, %v2452_v11 }
 0xa27   :  { %v2451_v8 = vmax.f32 %v2436_v63, 0.0  ;;  %3722 = vmatpush3.bf16.msra.mxu0 %v2456_v46  ;;  %v2019_v14 = vmul.f32 %v2017_v26, %v4707_v50 }
 0xa28   :  { %3723 = vmatprep.subr.bf16.mxu0 %v3855_v6  ;;  %v2470_v33 = vsel %vm221_vm1, %v2458_v35, 0  ;;  %v2567_v39 = vpop.permute.xlu1 %2566 }
 0xa29   :  { %v2457_v0 = vpack.c.bf16 %v2451_v8, %v2450_v57  ;;  %v2020_v19 = vadd.f32 %v2019_v14, %v4886_v22  ;;  %v2616_v18 = vpop.permute.xlu0 %2615 }
 0xa2b   :  { %3724 = vmatpush3.bf16.msra.mxu0 %v2457_v0 }
 0xa2c   :  { %3725 = vmatprep.subr.bf16.mxu0 %v3855_v6 }
 0xa2d   :  { %v2621_v27 = vpop.permute.xlu0 %2620 }
 0xa2f   :  { %3726 = vmatpush3.bf16.msra.mxu0 %v2470_v33  ;;  %v3833_v33 = vld [vmem:[%s4963_s2 + $0x120] sm:$0xff]  }
 0xa32   :  { %3728 = vmatmul.mubr.msk.bf16.vlgmr.msra.gmra.mrb[48].mxu0 %vm208_vm0, %v3321_v44  ;;  %v3834_v44 = vld [vmem:[%s4963_s2 + $0x128] sm:$0xff]  }
 0xb05   :  { %v2506_v43 = vpop.f32.mrb[48].mxu0 }
 0xb06   :  { %v2507_v54 = vadd.f32 %v2506_v43, %v2464_v45  ;;  %v3729_v16 = vpop.f32.mrb[49].mxu0  ;;  %v3836_v45 = vld [vmem:[%s4963_s2 + $0x134] sm:$0xff]  }
 0xb07   :  { %v2509_v25 = vpop.f32.mrb[50].mxu0  ;;  %3755 = vmatprep.mubr.msk.bf16.mxu0 %vm208_vm0, %v3836_v45 }
 0xb08   :  { %v2512_v49 = vmul.f32 1.442695, %v2507_v54  ;;  %v3730_v1 = vpop.f32.mrb[51].mxu0  ;;  %v2523_v58 = vrot.slane %v2507_v54, 1 }
 0xb0a   :  { %3848 = vpow2.f32 %v2512_v49 }
 0xb14   :  { %v3849_v12 = vpop.eup %3848 }
 0xb15   :  { %v2515_v31 = vrot.slane %v3849_v12, 2  ;;  %v2519_v32 = vrot.slane %v3849_v12, 3 }
 0xb17   :  { %v2517_v5 = vmul.f32 %v2515_v31, %v2020_v19  ;;  %v2521_v21 = vmul.f32 %v2519_v32, %v2027_v24 }
 0xb19   :  { %v4905_v13 = vadd.f32 %v2517_v5, %v2507_v54  ;;  %v4907_v60 = vadd.f32 %v2523_v58, %v2521_v21 }
 0xb1b   :  { %v2572_v53 = vrot.slane %v4905_v13, %v4082_v2 }
 0xb1d   :  { %v2573_v50 = vmul.f32 %v2572_v53, %v2537_v20  ;;  %v2574_v61 = vmul.f32 %v2572_v53, %v2542_v30  ;;  %v2575_v10 = vmul.f32 %v2572_v53, %v2547_v56  ;;  %v2576_v41 = vmul.f32 %v2572_v53, %v2552_v9  ;;  %v2660_v20 = vpop.permute.xlu1 %2659  ;;  %v2665_v30 = vpop.permute.xlu0 %2664 }
 0xb1e   :  { %v2577_v22 = vmul.f32 %v2572_v53, %v2557_v3  ;;  %v2578_v40 = vmul.f32 %v2572_v53, %v2562_v36  ;;  %v2579_v23 = vmul.f32 %v2572_v53, %v2567_v39  ;;  %v3837_v39 = vld [vmem:[%s4963_s2 + $0x13c] sm:$0xff]  }
 0xb1f   :  { %v2623_v52 = vadd.f32 %v2591_v4, %v2573_v50  ;;  %v2624_v24 = vadd.f32 %v2596_v62, %v2574_v61  ;;  %v2625_v28 = vadd.f32 %v2601_v59, %v2575_v10  ;;  %v2626_v17 = vadd.f32 %v2606_v47, %v2576_v41 }
 0xb20   :  { %v2627_v29 = vadd.f32 %v2611_v7, %v2577_v22  ;;  %v2628_v46 = vadd.f32 %v2616_v18, %v2578_v40  ;;  %v2629_v11 = vadd.f32 %v2621_v27, %v2579_v23 }
 0xb21   :  { %v2630_v55 = vmax.f32 %v2623_v52, 0.0  ;;  %v2631_v15 = vmax.f32 %v2624_v24, 0.0  ;;  %v2632_v37 = vmax.f32 %v2625_v28, 0.0  ;;  %v2633_v34 = vmax.f32 %v2626_v17, 0.0  ;;  %v2670_v4 = vpop.permute.xlu1 %2669  ;;  %v2675_v16 = vpop.permute.xlu0 %2674  ;;  %v3838_v52 = vld [vmem:[%s4963_s2 + $0x144] sm:$0xff]  }
 0xb22   :  { %v2634_v38 = vmax.f32 %v2627_v29, 0.0  ;;  %v2635_v63 = vmax.f32 %v2628_v46, 0.0  ;;  %v2636_v8 = vmax.f32 %v2629_v11, 0.0  ;;  %v3839_v24 = vld [vmem:[%s4963_s2 + $0x14c] ss:$0 sps:$4 sm:$0x11]  }
 0xb23   :  { %v2645_v2 = vpack.c.bf16 %v2631_v15, %v2630_v55  ;;  %v2646_v42 = vpack.c.bf16 %v2633_v34, %v2632_v37 }
 0xb24   :  { %v2647_v57 = vpack.c.bf16 %v2635_v63, %v2634_v38  ;;  %v2648_v0 = vpack.c.bf16 %v2636_v8, %v2636_v8 }
 0xb25   :  { %3731 = vmatprep.subr.bf16.mxu1 %v2645_v2  ;;  %v2680_v49 = vpop.permute.xlu1 %2679  ;;  %v2685_v7 = vpop.permute.xlu0 %2684 }
 0xb26   :  { %3732 = vmatpush3.bf16.msra.mxu1 %v2645_v2  ;;  %v2723_v35 = vsel %vm221_vm1, %v2648_v0, 0 }
 0xb27   :  { %3733 = vmatprep.subr.bf16.mxu1 %v2646_v42 }
 0xb29   :  { %v2690_v32 = vpop.permute.xlu1 %2689  ;;  %v2819_v28 = vpop.permute.xlu0 %2818 }
 0xb2a   :  { %3734 = vmatpush3.bf16.msra.mxu1 %v2646_v42 }
 0xb2b   :  { %3735 = vmatprep.subr.bf16.mxu1 %v2647_v57 }
 0xb2d   :  { %v2824_v17 = vpop.permute.xlu1 %2823  ;;  %v2829_v29 = vpop.permute.xlu0 %2828 }
 0xb2e   :  { %3736 = vmatpush3.bf16.msra.mxu1 %v2647_v57 }
 0xb2f   :  { %3785 = vmatprep.subr.msk.bf16.mxu1 %vm221_vm1, %v2648_v0 }
 0xb31   :  { %v2834_v23 = vpop.permute.xlu1 %2833  ;;  %v2839_v37 = vpop.permute.xlu0 %2838 }
 0xb32   :  { %3738 = vmatpush3.bf16.msra.mxu1 %v2723_v35 }
 0xb33   :  { %3763 = vmatprep.subr.bf16.mxu1 %v3855_v6 }
 0xb35   :  { %3740 = vmatmul.mubr.msk.bf16.vlgmr.msra.gmra.mrb[48].mxu1 %vm208_vm0, %v3833_v33  ;;  %v2849_v35 = vpop.permute.xlu0 %2848 }
 0xb36   :  { %3743 = vmatprep.mubr.msk.bf16.mxu1 %vm208_vm0, %v3834_v44 }
 0xb3d   :  { %3744 = vmatmul.mubr.msk.bf16.gmra.mrb[52].mxu1 %vm208_vm0, %v3835_v51 }
 0xb3e   :  { %3771 = vmatprep.mubr.msk.bf16.mxu1 %vm3856_vm2, %v3855_v6 }
 0xc08   :  { %v3741_v43 = vpop.f32.mrb[48].mxu1 }
 0xc09   :  { %v2768_v62 = vadd.f32 %v3741_v43, %v2670_v4  ;;  %v2759_v54 = vpop.f32.mrb[49].mxu1  ;;  %v2844_v4 = vpop.permute.xlu1 %2843 }
 0xc0a   :  { %v2760_v56 = vadd.f32 %v2759_v54, %v2660_v20  ;;  %v3742_v25 = vpop.f32.mrb[50].mxu1 }
 0xc0b   :  { %v2771_v1 = vadd.f32 %v3742_v25, %v2675_v16  ;;  %v2762_v9 = vpop.f32.mrb[51].mxu1  ;;  %v2791_v26 = vmax.f32 %v2768_v62, 0.0 }
 0xc0c   :  { %v2763_v59 = vadd.f32 %v2762_v9, %v2665_v30  ;;  %v2789_v47 = vmax.f32 %v2760_v56, 0.0  ;;  %v3382_v9 = vld [vmem:[%s4966_s3 + $0xa] sm:$0x3] }
 0xc0d   :  { %v2792_v14 = vmax.f32 %v2771_v1, 0.0 }
 0xc0e   :  { %v2790_v3 = vmax.f32 %v2763_v59, 0.0  ;;  %v2966_v59 = vpop.permute.xlu1 %2965 }
 0xc0f   :  { %v2805_v12 = vpack.c.bf16 %v2792_v14, %v2791_v26 }
 0xc10   :  { %v2804_v19 = vpack.c.bf16 %v2790_v3, %v2789_v47  ;;  %v3745_v31 = vpop.f32.mrb[52].mxu1 }
 0xc11   :  { %v2775_v5 = vpop.f32.mrb[53].mxu1  ;;  %v2784_v21 = vadd.f32 %v3745_v31, %v2690_v32 }
 0xc12   :  { %v2776_v58 = vadd.f32 %v2775_v5, %v2680_v49  ;;  %v3746_v36 = vpop.f32.mrb[54].mxu1  ;;  %3747 = vmatprep.subr.bf16.mxu0 %v2804_v19 }
 0xc13   :  { %v2778_v53 = vpop.f32.mrb[55].mxu1  ;;  %3748 = vmatpush3.bf16.msra.mxu0 %v2804_v19  ;;  %v2795_v61 = vmax.f32 %v2784_v21, 0.0  ;;  %v3029_v36 = vrot.slane %v4905_v13, 7 }
 0xc14   :  { %v2779_v50 = vadd.f32 %v2778_v53, %v2685_v7  ;;  %3749 = vmatprep.subr.bf16.mxu0 %v2805_v12  ;;  %v2793_v10 = vmax.f32 %v2776_v58, 0.0 }
 0xc15   :  { %v2807_v22 = vpack.c.bf16 %v2795_v61, %v2795_v61 }
 0xc16   :  { %v2794_v41 = vmax.f32 %v2779_v50, 0.0 }
 0xc17   :  { %3750 = vmatpush3.bf16.msra.mxu0 %v2805_v12  ;;  %v2882_v40 = vsel %vm221_vm1, %v2807_v22, 0 }
 0xc18   :  { %v2806_v18 = vpack.c.bf16 %v2794_v41, %v2793_v10 }
 0xc1a   :  { %3751 = vmatprep.subr.bf16.mxu0 %v2806_v18 }
 0xc1b   :  { %3752 = vmatpush3.bf16.msra.mxu0 %v2806_v18 }
 0xc1c   :  { %3786 = vmatprep.subr.msk.bf16.mxu0 %vm221_vm1, %v2807_v22 }
 0xc1f   :  { %3754 = vmatpush3.bf16.msra.mxu0 %v2882_v40 }
 0xc22   :  { %3756 = vmatmul.mubr.msk.bf16.vlgmr.msra.gmra.mrb[52].mxu0 %vm208_vm0, %v3837_v39 }
 0xc23   :  { %3759 = vmatprep.mubr.msk.bf16.mxu0 %vm208_vm0, %v3838_v52 }
 0xc2a   :  { %3760 = vmatmul.mubr.msk.bf16.gmra.mrb[56].mxu0 %vm208_vm0, %v3839_v24 }
 0xcf5   :  { %v3757_v46 = vpop.f32.mrb[52].mxu0 }
 0xcf6   :  { %v2927_v55 = vadd.f32 %v3757_v46, %v2829_v29  ;;  %v2918_v15 = vpop.f32.mrb[53].mxu0 }
 0xcf7   :  { %v2919_v34 = vadd.f32 %v2918_v15, %v2819_v28  ;;  %v3758_v2 = vpop.f32.mrb[54].mxu0 }
 0xcf8   :  { %v2930_v27 = vadd.f32 %v3758_v2, %v2834_v23  ;;  %v2921_v42 = vpop.f32.mrb[55].mxu0  ;;  %v2950_v63 = vmax.f32 %v2927_v55, 0.0 }
 0xcf9   :  { %v2922_v38 = vadd.f32 %v2921_v42, %v2824_v17  ;;  %v2948_v57 = vmax.f32 %v2919_v34, 0.0 }
 0xcfa   :  { %v2951_v11 = vmax.f32 %v2930_v27, 0.0 }
 0xcfb   :  { %v2949_v8 = vmax.f32 %v2922_v38, 0.0 }
 0xcfc   :  { %v2958_v0 = vpack.c.bf16 %v2951_v11, %v2950_v63 }
 0xcfd   :  { %v2957_v33 = vpack.c.bf16 %v2949_v8, %v2948_v57  ;;  %v3761_v44 = vpop.f32.mrb[56].mxu0 }
 0xcfe   :  { %v2943_v51 = vadd.f32 %v3761_v44, %v2849_v35  ;;  %v2934_v45 = vpop.f32.mrb[57].mxu0 }
 0xcff   :  { %v2935_v20 = vadd.f32 %v2934_v45, %v2839_v37  ;;  %v3762_v30 = vpop.f32.mrb[58].mxu0  ;;  %3764 = vmatpush3.bf16.msra.mxu1 %v2957_v33 }
 0xd00   :  { %v2937_v43 = vpop.f32.mrb[59].mxu0  ;;  %3765 = vmatprep.subr.bf16.mxu1 %v3855_v6  ;;  %v2954_v54 = vmax.f32 %v2943_v51, 0.0 }
 0xd01   :  { %v2938_v62 = vadd.f32 %v2937_v43, %v2844_v4  ;;  %v2952_v16 = vmax.f32 %v2935_v20, 0.0 }
 0xd02   :  { %v2960_v49 = vpack.c.bf16 %v2954_v54, %v2954_v54 }
 0xd03   :  { %v2953_v56 = vmax.f32 %v2938_v62, 0.0  ;;  %3766 = vmatpush3.bf16.msra.mxu1 %v2958_v0 }
 0xd04   :  { %3767 = vmatprep.subr.bf16.mxu1 %v3855_v6  ;;  %v2972_v1 = vsel %vm221_vm1, %v2960_v49, 0 }
 0xd05   :  { %v2959_v25 = vpack.c.bf16 %v2953_v56, %v2952_v16 }
 0xd07   :  { %3768 = vmatpush3.bf16.msra.mxu1 %v2959_v25 }
 0xd08   :  { %3769 = vmatprep.subr.bf16.mxu1 %v3855_v6 }
 0xd0b   :  { %3770 = vmatpush3.bf16.msra.mxu1 %v2972_v1 }
 0xd0e   :  { %3772 = vmatmul.mubr.msk.bf16.vlgmr.msra.gmra.mrb[56].mxu1 %vm208_vm0, %v3382_v9 }
 0xde1   :  { %v3008_v26 = vpop.f32.mrb[56].mxu1 }
 0xde2   :  { %v3009_v14 = vadd.f32 %v3008_v26, %v2966_v59  ;;  %v3773_v47 = vpop.f32.mrb[57].mxu1 }
 0xde3   :  { %v3011_v3 = vpop.f32.mrb[58].mxu1 }
 0xde4   :  { %v3014_v12 = vmul.f32 1.442695, %v3009_v14  ;;  %v3774_v19 = vpop.f32.mrb[59].mxu1  ;;  %v3025_v58 = vrot.slane %v3009_v14, 1 }
 0xde6   :  { %3850 = vpow2.f32 %v3014_v12 }
 0xdf0   :  { %v3851_v31 = vpop.eup %3850 }
 0xdf1   :  { %v3017_v32 = vrot.slane %v3851_v31, 2  ;;  %v3021_v6 = vrot.slane %v3851_v31, 3 }
 0xdf3   :  { %v3019_v5 = vmul.f32 %v3017_v32, %v4907_v60  ;;  %v3023_v21 = vmul.f32 %v3021_v6, %v4784_v48 }
 0xdf5   :  { %v3020_v7 = vadd.f32 %v3019_v5, %v3009_v14  ;;  %v3027_v53 = vadd.f32 %v3025_v58, %v3023_v21 }
 0xdf7   :  { %v3032_v50 = vrot.slane %v3020_v7, 6  ;;  %v3034_v61 = vsel %vm221_vm1, %v3027_v53, %v3029_v36 }
 0xdf9   :  { %v3036_v10 = vsel %vm3035_vm3, %v3034_v61, %v3032_v50 }
 0xdfa   :  { %3037 = vst [vmem:[%s4967_s6] sm:$0x7] %v3036_v10 }

</bundles_post_ra>
